<compile_context>
chip_gen: v7x
topology: tpu7x:2x2x1
jax: 0.10.0
libtpu: 0.0.40
codegen_flags: <defaults>
</compile_context>

<pallas_src>
import functools

import jax
import jax.numpy as jnp
from jax.experimental import pallas as pl
from jax.experimental.pallas import tpu as pltpu


def _round_up(x, m):
    return ((x + m - 1) // m) * m


def regu_recurrence_kernel(x_ref, h0_ref, wx_ref, wh_ref, b_ref, out_ref,
                           h_scr, gx_scr, *, t_blk, hp):
    """One (batch block, time block) grid step.

    x_ref  : (T_BLK, Bb, I)    raw inputs for this block
    h0_ref : (Bb, Hp)          initial hidden state (this batch block)
    wx_ref : (I, 2*Hp)         fused input weights  [Wxz | Wxh]   (Buffered(1))
    wh_ref : (Hp, 2*Hp)        fused recurrent wts  [Whz | Whh]   (Buffered(1))
    b_ref  : (1, 2*Hp)         fused bias           [bz  | bh ]   (Buffered(1))
    out_ref: (T_BLK, Bb, Hp)   outputs for this block
    h_scr  : (Bb, Hp) f32      hidden state carried across time blocks
    gx_scr : (T_BLK, Bb, 2Hp)  per-block x-projection staging buffer
    """
    # Re-initialize the carried hidden state at the first time block of each
    # batch block (time is the innermost, "arbitrary" grid axis).
    @pl.when(pl.program_id(1) == 0)
    def _():
        h_scr[...] = h0_ref[...]

    # ---- Stage 1: time-parallel input projection (no serial dependency). ----
    wx = wx_ref[...]          # (I, 2Hp) — tiny, fine to hold in vregs
    bias = b_ref[...]         # (1, 2Hp)

    def xproj(s, carry):
        gx_scr[s] = jnp.dot(x_ref[s], wx,
                            preferred_element_type=jnp.float32) + bias
        return carry

    jax.lax.fori_loop(0, t_blk, xproj, 0, unroll=min(t_blk, 8))

    # ---- Stage 2: sequential recurrence, one fused MXU matmul per step. ----
    def body(s, h):
        # (Bb, Hp) @ (Hp, 2Hp); Wh stays in VMEM (no forced register hoist).
        pre = gx_scr[s] + jnp.dot(h, wh_ref[...],
                                  preferred_element_type=jnp.float32)
        z = jax.nn.sigmoid(pre[:, :hp])        # update gate
        c = jnp.maximum(pre[:, hp:], 0.0)      # ReLU candidate
        # h_new = z*h + (1-z)*c, written with one fewer multiply.
        h_new = c + z * (h - c)
        out_ref[s] = h_new.astype(out_ref.dtype)
        return h_new

    h_last = jax.lax.fori_loop(0, t_blk, body, h_scr[...],
                               unroll=min(t_blk, 8))
    h_scr[...] = h_last


def regu_layer(inputs, h0, params, *, max_t_blk=32):
    """inputs: (T, B, I) f32, h0: (B, H) f32.
    Returns (outputs (T, B, H), final_state (B, H))."""
    wxz, whz, bz, wxh, whh, bh = params
    T, B, I = inputs.shape
    H = h0.shape[1]

    f32 = jnp.float32

    # ---- Padded / blocked geometry. ----
    Hp = _round_up(H, 128)                     # lane-dense feature dim
    Bp0 = _round_up(B, 8)                      # sublane-dense batch dim
    n_b_blocks = 2 if Bp0 >= 16 else 1         # 2 blocks -> megacore on v7x
    b_blk = _round_up(-(-Bp0 // n_b_blocks), 8)
    Bp = b_blk * n_b_blocks
    t_blk = min(max_t_blk, _round_up(T, 8))    # big time blocks, no toy waste
    Tp = _round_up(T, t_blk)

    def pad2(w, r, c):
        w = w.astype(f32)
        return jnp.pad(w, ((0, r - w.shape[0]), (0, c - w.shape[1])))

    # Zero padding keeps padded state lanes exactly zero: padded pre-activation
    # is 0 -> z = 0.5, cand = 0 -> h_new = 0.5 * 0 = 0 (by induction from h0=0).
    wx_cat = jnp.concatenate([pad2(wxz, I, Hp), pad2(wxh, I, Hp)], axis=1)    # (I, 2Hp)
    wh_cat = jnp.concatenate([pad2(whz, Hp, Hp), pad2(whh, Hp, Hp)], axis=1)  # (Hp, 2Hp)
    b_cat = jnp.concatenate([pad2(bz, 1, Hp), pad2(bh, 1, Hp)], axis=1)       # (1, 2Hp)

    x_p = jnp.pad(inputs.astype(f32), ((0, Tp - T), (0, Bp - B), (0, 0)))     # (Tp, Bp, I)
    h0_p = jnp.pad(h0.astype(f32), ((0, Bp - B), (0, Hp - H)))                # (Bp, Hp)

    kernel = functools.partial(regu_recurrence_kernel, t_blk=t_blk, hp=Hp)

    # ---- Explicit VMEM budget (per review): blocks + weights + scratch. ----
    needed_vmem = (
        2 * t_blk * b_blk * I * 4            # x blocks (double-buffered)
        + 2 * t_blk * b_blk * Hp * 4         # out blocks (double-buffered)
        + 2 * b_blk * Hp * 4                 # h0 block
        + I * 2 * Hp * 4                     # Wx (single-buffered)
        + Hp * 2 * Hp * 4                    # Wh (single-buffered)
        + 8 * 2 * Hp * 4                     # bias (sublane-padded)
        + b_blk * Hp * 4                     # h scratch
        + t_blk * b_blk * 2 * Hp * 4         # gx scratch
    )
    vmem_limit = int(needed_vmem) + (16 << 20)   # generous compiler headroom

    out_p = pl.pallas_call(
        kernel,
        out_shape=jax.ShapeDtypeStruct((Tp, Bp, Hp), jnp.float32),
        grid_spec=pltpu.PrefetchScalarGridSpec(
            num_scalar_prefetch=0,
            grid=(Bp // b_blk, Tp // t_blk),          # (batch blocks, time blocks)
            in_specs=[
                pl.BlockSpec((t_blk, b_blk, I), lambda b, t: (t, b, 0)),   # x
                pl.BlockSpec((b_blk, Hp), lambda b, t: (b, 0)),            # h0
                pl.BlockSpec((I, 2 * Hp), lambda b, t: (0, 0),
                             pipeline_mode=pl.Buffered(1)),                # Wx
                pl.BlockSpec((Hp, 2 * Hp), lambda b, t: (0, 0),
                             pipeline_mode=pl.Buffered(1)),                # Wh
                pl.BlockSpec((1, 2 * Hp), lambda b, t: (0, 0),
                             pipeline_mode=pl.Buffered(1)),                # bias
            ],
            out_specs=pl.BlockSpec((t_blk, b_blk, Hp), lambda b, t: (t, b, 0)),
            scratch_shapes=[
                pltpu.VMEM((b_blk, Hp), jnp.float32),            # carried h
                pltpu.VMEM((t_blk, b_blk, 2 * Hp), jnp.float32), # gx staging
            ],
        ),
        compiler_params=pltpu.CompilerParams(
            dimension_semantics=("parallel", "arbitrary"),  # batch ∥, time serial
            vmem_limit_bytes=vmem_limit,
        ),
    )(x_p, h0_p, wx_cat, wh_cat, b_cat)

    outputs = out_p[:T, :B, :H]
    h_fin = outputs[T - 1]  # out == state for this cell
    return outputs, h_fin


def regu_layer_ref(inputs, h0, params):
    """Pure-JAX reference mirroring the PyTorch per-step loop."""
    wxz, whz, bz, wxh, whh, bh = params

    def step(h, x):
        z = jax.nn.sigmoid(x @ wxz + h @ whz + bz)
        c = jnp.maximum(x @ wxh + h @ whh + bh, 0.0)
        h_new = z * h + (1.0 - z) * c
        return h_new, h_new

    h_fin, outs = jax.lax.scan(step, h0, inputs)
    return outs, h_fin


if __name__ == "__main__":
    T, B, I, H = 8, 4, 16, 32  # cell_args = (input_size=I, hidden_size=H)

    key = jax.random.PRNGKey(0)
    ks = jax.random.split(key, 8)
    inputs = jax.random.normal(ks[0], (T, B, I), dtype=jnp.float32)
    h0 = jax.random.normal(ks[1], (B, H), dtype=jnp.float32)

    scale = 0.1
    params = (
        scale * jax.random.normal(ks[2], (I, H), dtype=jnp.float32),  # Wxz
        scale * jax.random.normal(ks[3], (H, H), dtype=jnp.float32),  # Whz
        scale * jax.random.normal(ks[4], (1, H), dtype=jnp.float32),  # bz
        scale * jax.random.normal(ks[5], (I, H), dtype=jnp.float32),  # Wxh
        scale * jax.random.normal(ks[6], (H, H), dtype=jnp.float32),  # Whh
        scale * jax.random.normal(ks[7], (1, H), dtype=jnp.float32),  # bh
    )

    outs, h_fin = regu_layer(inputs, h0, params)
    jax.block_until_ready((outs, h_fin))

    outs_ref, h_fin_ref = regu_layer_ref(inputs, h0, params)
    assert outs.shape == (T, B, H) and h_fin.shape == (B, H)
    assert jnp.allclose(outs, outs_ref, atol=1e-5, rtol=1e-5)
    assert jnp.allclose(h_fin, h_fin_ref, atol=1e-5, rtol=1e-5)

    print("KERNEL_OK")
</pallas_src>

<mosaic_0001>
module attributes {stable_mosaic.version = 11 : i64} {
  func.func @regu_recurrence_kernel(%arg0: i32, %arg1: i32, %arg2: memref<8x8x16xf32, #tpu.memory_space<vmem>>, %arg3: memref<8x128xf32, #tpu.memory_space<vmem>>, %arg4: memref<16x256xf32, #tpu.memory_space<vmem>>, %arg5: memref<128x256xf32, #tpu.memory_space<vmem>>, %arg6: memref<1x256xf32, #tpu.memory_space<vmem>>, %arg7: memref<8x8x128xf32, #tpu.memory_space<vmem>>, %arg8: memref<8x128xf32, #tpu.memory_space<vmem>>, %arg9: memref<8x8x256xf32, #tpu.memory_space<vmem>>) attributes {dimension_semantics = [#tpu.dimension_semantics<parallel>, #tpu.dimension_semantics<arbitrary>], iteration_bounds = array<i64: 1, 1>, scalar_prefetch = 0 : i64, scratch_operands = 2 : i64, tpu.core_type = #tpu.core_type<tc>, window_params = [{transform_indices = @transform_0, window_bounds = array<i64: 8, 8, 16>}, {transform_indices = @transform_1, window_bounds = array<i64: 8, 128>}, {pipeline_mode = #tpu.pipeline_mode<synchronous>, transform_indices = @transform_2, window_bounds = array<i64: 16, 256>}, {pipeline_mode = #tpu.pipeline_mode<synchronous>, transform_indices = @transform_3, window_bounds = array<i64: 128, 256>}, {pipeline_mode = #tpu.pipeline_mode<synchronous>, transform_indices = @transform_4, window_bounds = array<i64: 1, 256>}, {transform_indices = @transform_5, window_bounds = array<i64: 8, 8, 128>}]} {
    %c0_i32 = arith.constant 0 : i32
    %0 = arith.cmpi eq, %arg1, %c0_i32 : i32
    %1 = arith.extui %0 : i1 to i32
    %c0_i32_0 = arith.constant 0 : i32
    %2 = arith.cmpi ne, %1, %c0_i32_0 : i32
    scf.if %2 {
      %c0_129 = arith.constant 0 : index
      %c0_130 = arith.constant 0 : index
      %263 = vector.load %arg3[%c0_129, %c0_130] : memref<8x128xf32, #tpu.memory_space<vmem>>, vector<8x128xf32>
      %c0_131 = arith.constant 0 : index
      %c0_132 = arith.constant 0 : index
      %264 = vector.load %arg8[%c0_131, %c0_132] : memref<8x128xf32, #tpu.memory_space<vmem>>, vector<8x128xf32>
      tpu.vector_store %arg8[%c0_131, %c0_132], %263 {strides = array<i32>} : memref<8x128xf32, #tpu.memory_space<vmem>>, vector<8x128xf32>,
    } else {
    }
    %c0 = arith.constant 0 : index
    %c0_1 = arith.constant 0 : index
    %3 = vector.load %arg4[%c0, %c0_1] : memref<16x256xf32, #tpu.memory_space<vmem>>, vector<16x256xf32>
    %c0_2 = arith.constant 0 : index
    %c0_3 = arith.constant 0 : index
    %4 = vector.load %arg6[%c0_2, %c0_3] : memref<1x256xf32, #tpu.memory_space<vmem>>, vector<1x256xf32>
    %c0_i32_4 = arith.constant 0 : i32
    %5 = arith.index_cast %c0_i32_4 : i32 to index
    %c0_5 = arith.constant 0 : index
    %c0_6 = arith.constant 0 : index
    %6 = vector.load %arg2[%5, %c0_5, %c0_6] : memref<8x8x16xf32, #tpu.memory_space<vmem>>, vector<1x8x16xf32>
    %7 = vector.shape_cast %6 : vector<1x8x16xf32> to vector<8x16xf32>
    %cst = arith.constant dense<0.000000e+00> : vector<8x256xf32>
    %8 = tpu.matmul %7, %3, %cst {dimension_numbers = #tpu.dot_dimension_numbers<[1], [0], [0], [1], [0, 0, 1, 1], [], []>} : vector<8x16xf32>, vector<16x256xf32>, vector<8x256xf32> -> vector<8x256xf32>
    %9 = vector.broadcast %4 : vector<1x256xf32> to vector<8x256xf32>
    %10 = arith.addf %8, %9 : vector<8x256xf32>
    %11 = arith.index_cast %c0_i32_4 : i32 to index
    %c0_7 = arith.constant 0 : index
    %c0_8 = arith.constant 0 : index
    %12 = vector.load %arg9[%11, %c0_7, %c0_8] : memref<8x8x256xf32, #tpu.memory_space<vmem>>, vector<1x8x256xf32>
    %13 = vector.shape_cast %12 : vector<1x8x256xf32> to vector<8x256xf32>
    %14 = vector.shape_cast %10 : vector<8x256xf32> to vector<1x8x256xf32>
    tpu.vector_store %arg9[%11, %c0_7, %c0_8], %14 {strides = array<i32>} : memref<8x8x256xf32, #tpu.memory_space<vmem>>, vector<1x8x256xf32>,
    %c1_i32 = arith.constant 1 : i32
    %15 = arith.index_cast %c1_i32 : i32 to index
    %c0_9 = arith.constant 0 : index
    %c0_10 = arith.constant 0 : index
    %16 = vector.load %arg2[%15, %c0_9, %c0_10] : memref<8x8x16xf32, #tpu.memory_space<vmem>>, vector<1x8x16xf32>
    %17 = vector.shape_cast %16 : vector<1x8x16xf32> to vector<8x16xf32>
    %cst_11 = arith.constant dense<0.000000e+00> : vector<8x256xf32>
    %18 = tpu.matmul %17, %3, %cst_11 {dimension_numbers = #tpu.dot_dimension_numbers<[1], [0], [0], [1], [0, 0, 1, 1], [], []>} : vector<8x16xf32>, vector<16x256xf32>, vector<8x256xf32> -> vector<8x256xf32>
    %19 = vector.broadcast %4 : vector<1x256xf32> to vector<8x256xf32>
    %20 = arith.addf %18, %19 : vector<8x256xf32>
    %21 = arith.index_cast %c1_i32 : i32 to index
    %c0_12 = arith.constant 0 : index
    %c0_13 = arith.constant 0 : index
    %22 = vector.load %arg9[%21, %c0_12, %c0_13] : memref<8x8x256xf32, #tpu.memory_space<vmem>>, vector<1x8x256xf32>
    %23 = vector.shape_cast %22 : vector<1x8x256xf32> to vector<8x256xf32>
    %24 = vector.shape_cast %20 : vector<8x256xf32> to vector<1x8x256xf32>
    tpu.vector_store %arg9[%21, %c0_12, %c0_13], %24 {strides = array<i32>} : memref<8x8x256xf32, #tpu.memory_space<vmem>>, vector<1x8x256xf32>,
    %c2_i32 = arith.constant 2 : i32
    %25 = arith.index_cast %c2_i32 : i32 to index
    %c0_14 = arith.constant 0 : index
    %c0_15 = arith.constant 0 : index
    %26 = vector.load %arg2[%25, %c0_14, %c0_15] : memref<8x8x16xf32, #tpu.memory_space<vmem>>, vector<1x8x16xf32>
    %27 = vector.shape_cast %26 : vector<1x8x16xf32> to vector<8x16xf32>
    %cst_16 = arith.constant dense<0.000000e+00> : vector<8x256xf32>
    %28 = tpu.matmul %27, %3, %cst_16 {dimension_numbers = #tpu.dot_dimension_numbers<[1], [0], [0], [1], [0, 0, 1, 1], [], []>} : vector<8x16xf32>, vector<16x256xf32>, vector<8x256xf32> -> vector<8x256xf32>
    %29 = vector.broadcast %4 : vector<1x256xf32> to vector<8x256xf32>
    %30 = arith.addf %28, %29 : vector<8x256xf32>
    %31 = arith.index_cast %c2_i32 : i32 to index
    %c0_17 = arith.constant 0 : index
    %c0_18 = arith.constant 0 : index
    %32 = vector.load %arg9[%31, %c0_17, %c0_18] : memref<8x8x256xf32, #tpu.memory_space<vmem>>, vector<1x8x256xf32>
    %33 = vector.shape_cast %32 : vector<1x8x256xf32> to vector<8x256xf32>
    %34 = vector.shape_cast %30 : vector<8x256xf32> to vector<1x8x256xf32>
    tpu.vector_store %arg9[%31, %c0_17, %c0_18], %34 {strides = array<i32>} : memref<8x8x256xf32, #tpu.memory_space<vmem>>, vector<1x8x256xf32>,
    %c3_i32 = arith.constant 3 : i32
    %35 = arith.index_cast %c3_i32 : i32 to index
    %c0_19 = arith.constant 0 : index
    %c0_20 = arith.constant 0 : index
    %36 = vector.load %arg2[%35, %c0_19, %c0_20] : memref<8x8x16xf32, #tpu.memory_space<vmem>>, vector<1x8x16xf32>
    %37 = vector.shape_cast %36 : vector<1x8x16xf32> to vector<8x16xf32>
    %cst_21 = arith.constant dense<0.000000e+00> : vector<8x256xf32>
    %38 = tpu.matmul %37, %3, %cst_21 {dimension_numbers = #tpu.dot_dimension_numbers<[1], [0], [0], [1], [0, 0, 1, 1], [], []>} : vector<8x16xf32>, vector<16x256xf32>, vector<8x256xf32> -> vector<8x256xf32>
    %39 = vector.broadcast %4 : vector<1x256xf32> to vector<8x256xf32>
    %40 = arith.addf %38, %39 : vector<8x256xf32>
    %41 = arith.index_cast %c3_i32 : i32 to index
    %c0_22 = arith.constant 0 : index
    %c0_23 = arith.constant 0 : index
    %42 = vector.load %arg9[%41, %c0_22, %c0_23] : memref<8x8x256xf32, #tpu.memory_space<vmem>>, vector<1x8x256xf32>
    %43 = vector.shape_cast %42 : vector<1x8x256xf32> to vector<8x256xf32>
    %44 = vector.shape_cast %40 : vector<8x256xf32> to vector<1x8x256xf32>
    tpu.vector_store %arg9[%41, %c0_22, %c0_23], %44 {strides = array<i32>} : memref<8x8x256xf32, #tpu.memory_space<vmem>>, vector<1x8x256xf32>,
    %c4_i32 = arith.constant 4 : i32
    %45 = arith.index_cast %c4_i32 : i32 to index
    %c0_24 = arith.constant 0 : index
    %c0_25 = arith.constant 0 : index
    %46 = vector.load %arg2[%45, %c0_24, %c0_25] : memref<8x8x16xf32, #tpu.memory_space<vmem>>, vector<1x8x16xf32>
    %47 = vector.shape_cast %46 : vector<1x8x16xf32> to vector<8x16xf32>
    %cst_26 = arith.constant dense<0.000000e+00> : vector<8x256xf32>
    %48 = tpu.matmul %47, %3, %cst_26 {dimension_numbers = #tpu.dot_dimension_numbers<[1], [0], [0], [1], [0, 0, 1, 1], [], []>} : vector<8x16xf32>, vector<16x256xf32>, vector<8x256xf32> -> vector<8x256xf32>
    %49 = vector.broadcast %4 : vector<1x256xf32> to vector<8x256xf32>
    %50 = arith.addf %48, %49 : vector<8x256xf32>
    %51 = arith.index_cast %c4_i32 : i32 to index
    %c0_27 = arith.constant 0 : index
    %c0_28 = arith.constant 0 : index
    %52 = vector.load %arg9[%51, %c0_27, %c0_28] : memref<8x8x256xf32, #tpu.memory_space<vmem>>, vector<1x8x256xf32>
    %53 = vector.shape_cast %52 : vector<1x8x256xf32> to vector<8x256xf32>
    %54 = vector.shape_cast %50 : vector<8x256xf32> to vector<1x8x256xf32>
    tpu.vector_store %arg9[%51, %c0_27, %c0_28], %54 {strides = array<i32>} : memref<8x8x256xf32, #tpu.memory_space<vmem>>, vector<1x8x256xf32>,
    %c5_i32 = arith.constant 5 : i32
    %55 = arith.index_cast %c5_i32 : i32 to index
    %c0_29 = arith.constant 0 : index
    %c0_30 = arith.constant 0 : index
    %56 = vector.load %arg2[%55, %c0_29, %c0_30] : memref<8x8x16xf32, #tpu.memory_space<vmem>>, vector<1x8x16xf32>
    %57 = vector.shape_cast %56 : vector<1x8x16xf32> to vector<8x16xf32>
    %cst_31 = arith.constant dense<0.000000e+00> : vector<8x256xf32>
    %58 = tpu.matmul %57, %3, %cst_31 {dimension_numbers = #tpu.dot_dimension_numbers<[1], [0], [0], [1], [0, 0, 1, 1], [], []>} : vector<8x16xf32>, vector<16x256xf32>, vector<8x256xf32> -> vector<8x256xf32>
    %59 = vector.broadcast %4 : vector<1x256xf32> to vector<8x256xf32>
    %60 = arith.addf %58, %59 : vector<8x256xf32>
    %61 = arith.index_cast %c5_i32 : i32 to index
    %c0_32 = arith.constant 0 : index
    %c0_33 = arith.constant 0 : index
    %62 = vector.load %arg9[%61, %c0_32, %c0_33] : memref<8x8x256xf32, #tpu.memory_space<vmem>>, vector<1x8x256xf32>
    %63 = vector.shape_cast %62 : vector<1x8x256xf32> to vector<8x256xf32>
    %64 = vector.shape_cast %60 : vector<8x256xf32> to vector<1x8x256xf32>
    tpu.vector_store %arg9[%61, %c0_32, %c0_33], %64 {strides = array<i32>} : memref<8x8x256xf32, #tpu.memory_space<vmem>>, vector<1x8x256xf32>,
    %c6_i32 = arith.constant 6 : i32
    %65 = arith.index_cast %c6_i32 : i32 to index
    %c0_34 = arith.constant 0 : index
    %c0_35 = arith.constant 0 : index
    %66 = vector.load %arg2[%65, %c0_34, %c0_35] : memref<8x8x16xf32, #tpu.memory_space<vmem>>, vector<1x8x16xf32>
    %67 = vector.shape_cast %66 : vector<1x8x16xf32> to vector<8x16xf32>
    %cst_36 = arith.constant dense<0.000000e+00> : vector<8x256xf32>
    %68 = tpu.matmul %67, %3, %cst_36 {dimension_numbers = #tpu.dot_dimension_numbers<[1], [0], [0], [1], [0, 0, 1, 1], [], []>} : vector<8x16xf32>, vector<16x256xf32>, vector<8x256xf32> -> vector<8x256xf32>
    %69 = vector.broadcast %4 : vector<1x256xf32> to vector<8x256xf32>
    %70 = arith.addf %68, %69 : vector<8x256xf32>
    %71 = arith.index_cast %c6_i32 : i32 to index
    %c0_37 = arith.constant 0 : index
    %c0_38 = arith.constant 0 : index
    %72 = vector.load %arg9[%71, %c0_37, %c0_38] : memref<8x8x256xf32, #tpu.memory_space<vmem>>, vector<1x8x256xf32>
    %73 = vector.shape_cast %72 : vector<1x8x256xf32> to vector<8x256xf32>
    %74 = vector.shape_cast %70 : vector<8x256xf32> to vector<1x8x256xf32>
    tpu.vector_store %arg9[%71, %c0_37, %c0_38], %74 {strides = array<i32>} : memref<8x8x256xf32, #tpu.memory_space<vmem>>, vector<1x8x256xf32>,
    %c7_i32 = arith.constant 7 : i32
    %75 = arith.index_cast %c7_i32 : i32 to index
    %c0_39 = arith.constant 0 : index
    %c0_40 = arith.constant 0 : index
    %76 = vector.load %arg2[%75, %c0_39, %c0_40] : memref<8x8x16xf32, #tpu.memory_space<vmem>>, vector<1x8x16xf32>
    %77 = vector.shape_cast %76 : vector<1x8x16xf32> to vector<8x16xf32>
    %cst_41 = arith.constant dense<0.000000e+00> : vector<8x256xf32>
    %78 = tpu.matmul %77, %3, %cst_41 {dimension_numbers = #tpu.dot_dimension_numbers<[1], [0], [0], [1], [0, 0, 1, 1], [], []>} : vector<8x16xf32>, vector<16x256xf32>, vector<8x256xf32> -> vector<8x256xf32>
    %79 = vector.broadcast %4 : vector<1x256xf32> to vector<8x256xf32>
    %80 = arith.addf %78, %79 : vector<8x256xf32>
    %81 = arith.index_cast %c7_i32 : i32 to index
    %c0_42 = arith.constant 0 : index
    %c0_43 = arith.constant 0 : index
    %82 = vector.load %arg9[%81, %c0_42, %c0_43] : memref<8x8x256xf32, #tpu.memory_space<vmem>>, vector<1x8x256xf32>
    %83 = vector.shape_cast %82 : vector<1x8x256xf32> to vector<8x256xf32>
    %84 = vector.shape_cast %80 : vector<8x256xf32> to vector<1x8x256xf32>
    tpu.vector_store %arg9[%81, %c0_42, %c0_43], %84 {strides = array<i32>} : memref<8x8x256xf32, #tpu.memory_space<vmem>>, vector<1x8x256xf32>,
    %c8_i32 = arith.constant 8 : i32
    %c0_44 = arith.constant 0 : index
    %c0_45 = arith.constant 0 : index
    %85 = vector.load %arg8[%c0_44, %c0_45] : memref<8x128xf32, #tpu.memory_space<vmem>>, vector<8x128xf32>
    %c0_i32_46 = arith.constant 0 : i32
    %86 = arith.index_cast %c0_i32_46 : i32 to index
    %c0_47 = arith.constant 0 : index
    %c0_48 = arith.constant 0 : index
    %87 = vector.load %arg9[%86, %c0_47, %c0_48] : memref<8x8x256xf32, #tpu.memory_space<vmem>>, vector<1x8x256xf32>
    %88 = vector.shape_cast %87 : vector<1x8x256xf32> to vector<8x256xf32>
    %c0_49 = arith.constant 0 : index
    %c0_50 = arith.constant 0 : index
    %89 = vector.load %arg5[%c0_49, %c0_50] : memref<128x256xf32, #tpu.memory_space<vmem>>, vector<128x256xf32>
    %cst_51 = arith.constant dense<0.000000e+00> : vector<8x256xf32>
    %90 = tpu.matmul %85, %89, %cst_51 {dimension_numbers = #tpu.dot_dimension_numbers<[1], [0], [0], [1], [0, 0, 1, 1], [], []>} : vector<8x128xf32>, vector<128x256xf32>, vector<8x256xf32> -> vector<8x256xf32>
    %91 = arith.addf %88, %90 : vector<8x256xf32>
    %92 = vector.extract_strided_slice %91 {offsets = [0, 0], sizes = [8, 128], strides = [1, 1]} : vector<8x256xf32> to vector<8x128xf32>
    %93 = arith.negf %92 : vector<8x128xf32>
    %94 = math.exp %93 : vector<8x128xf32>
    %cst_52 = arith.constant 1.000000e+00 : f32
    %95 = vector.broadcast %cst_52 : f32 to vector<8x128xf32>
    %96 = arith.addf %95, %94 : vector<8x128xf32>
    %97 = arith.divf %95, %96 : vector<8x128xf32>
    %98 = vector.extract_strided_slice %91 {offsets = [0, 128], sizes = [8, 128], strides = [1, 1]} : vector<8x256xf32> to vector<8x128xf32>
    %cst_53 = arith.constant 0.000000e+00 : f32
    %99 = vector.broadcast %cst_53 : f32 to vector<8x128xf32>
    %100 = arith.maximumf %98, %99 : vector<8x128xf32>
    %101 = arith.subf %85, %100 : vector<8x128xf32>
    %102 = arith.mulf %97, %101 : vector<8x128xf32>
    %103 = arith.addf %100, %102 : vector<8x128xf32>
    %104 = arith.index_cast %c0_i32_46 : i32 to index
    %c0_54 = arith.constant 0 : index
    %c0_55 = arith.constant 0 : index
    %105 = vector.load %arg7[%104, %c0_54, %c0_55] : memref<8x8x128xf32, #tpu.memory_space<vmem>>, vector<1x8x128xf32>
    %106 = vector.shape_cast %105 : vector<1x8x128xf32> to vector<8x128xf32>
    %107 = vector.shape_cast %103 : vector<8x128xf32> to vector<1x8x128xf32>
    tpu.vector_store %arg7[%104, %c0_54, %c0_55], %107 {strides = array<i32>} : memref<8x8x128xf32, #tpu.memory_space<vmem>>, vector<1x8x128xf32>,
    %c1_i32_56 = arith.constant 1 : i32
    %108 = arith.index_cast %c1_i32_56 : i32 to index
    %c0_57 = arith.constant 0 : index
    %c0_58 = arith.constant 0 : index
    %109 = vector.load %arg9[%108, %c0_57, %c0_58] : memref<8x8x256xf32, #tpu.memory_space<vmem>>, vector<1x8x256xf32>
    %110 = vector.shape_cast %109 : vector<1x8x256xf32> to vector<8x256xf32>
    %c0_59 = arith.constant 0 : index
    %c0_60 = arith.constant 0 : index
    %111 = vector.load %arg5[%c0_59, %c0_60] : memref<128x256xf32, #tpu.memory_space<vmem>>, vector<128x256xf32>
    %cst_61 = arith.constant dense<0.000000e+00> : vector<8x256xf32>
    %112 = tpu.matmul %103, %111, %cst_61 {dimension_numbers = #tpu.dot_dimension_numbers<[1], [0], [0], [1], [0, 0, 1, 1], [], []>} : vector<8x128xf32>, vector<128x256xf32>, vector<8x256xf32> -> vector<8x256xf32>
    %113 = arith.addf %110, %112 : vector<8x256xf32>
    %114 = vector.extract_strided_slice %113 {offsets = [0, 0], sizes = [8, 128], strides = [1, 1]} : vector<8x256xf32> to vector<8x128xf32>
    %115 = arith.negf %114 : vector<8x128xf32>
    %116 = math.exp %115 : vector<8x128xf32>
    %cst_62 = arith.constant 1.000000e+00 : f32
    %117 = vector.broadcast %cst_62 : f32 to vector<8x128xf32>
    %118 = arith.addf %117, %116 : vector<8x128xf32>
    %119 = arith.divf %117, %118 : vector<8x128xf32>
    %120 = vector.extract_strided_slice %113 {offsets = [0, 128], sizes = [8, 128], strides = [1, 1]} : vector<8x256xf32> to vector<8x128xf32>
    %cst_63 = arith.constant 0.000000e+00 : f32
    %121 = vector.broadcast %cst_63 : f32 to vector<8x128xf32>
    %122 = arith.maximumf %120, %121 : vector<8x128xf32>
    %123 = arith.subf %103, %122 : vector<8x128xf32>
    %124 = arith.mulf %119, %123 : vector<8x128xf32>
    %125 = arith.addf %122, %124 : vector<8x128xf32>
    %126 = arith.index_cast %c1_i32_56 : i32 to index
    %c0_64 = arith.constant 0 : index
    %c0_65 = arith.constant 0 : index
    %127 = vector.load %arg7[%126, %c0_64, %c0_65] : memref<8x8x128xf32, #tpu.memory_space<vmem>>, vector<1x8x128xf32>
    %128 = vector.shape_cast %127 : vector<1x8x128xf32> to vector<8x128xf32>
    %129 = vector.shape_cast %125 : vector<8x128xf32> to vector<1x8x128xf32>
    tpu.vector_store %arg7[%126, %c0_64, %c0_65], %129 {strides = array<i32>} : memref<8x8x128xf32, #tpu.memory_space<vmem>>, vector<1x8x128xf32>,
    %c2_i32_66 = arith.constant 2 : i32
    %130 = arith.index_cast %c2_i32_66 : i32 to index
    %c0_67 = arith.constant 0 : index
    %c0_68 = arith.constant 0 : index
    %131 = vector.load %arg9[%130, %c0_67, %c0_68] : memref<8x8x256xf32, #tpu.memory_space<vmem>>, vector<1x8x256xf32>
    %132 = vector.shape_cast %131 : vector<1x8x256xf32> to vector<8x256xf32>
    %c0_69 = arith.constant 0 : index
    %c0_70 = arith.constant 0 : index
    %133 = vector.load %arg5[%c0_69, %c0_70] : memref<128x256xf32, #tpu.memory_space<vmem>>, vector<128x256xf32>
    %cst_71 = arith.constant dense<0.000000e+00> : vector<8x256xf32>
    %134 = tpu.matmul %125, %133, %cst_71 {dimension_numbers = #tpu.dot_dimension_numbers<[1], [0], [0], [1], [0, 0, 1, 1], [], []>} : vector<8x128xf32>, vector<128x256xf32>, vector<8x256xf32> -> vector<8x256xf32>
    %135 = arith.addf %132, %134 : vector<8x256xf32>
    %136 = vector.extract_strided_slice %135 {offsets = [0, 0], sizes = [8, 128], strides = [1, 1]} : vector<8x256xf32> to vector<8x128xf32>
    %137 = arith.negf %136 : vector<8x128xf32>
    %138 = math.exp %137 : vector<8x128xf32>
    %cst_72 = arith.constant 1.000000e+00 : f32
    %139 = vector.broadcast %cst_72 : f32 to vector<8x128xf32>
    %140 = arith.addf %139, %138 : vector<8x128xf32>
    %141 = arith.divf %139, %140 : vector<8x128xf32>
    %142 = vector.extract_strided_slice %135 {offsets = [0, 128], sizes = [8, 128], strides = [1, 1]} : vector<8x256xf32> to vector<8x128xf32>
    %cst_73 = arith.constant 0.000000e+00 : f32
    %143 = vector.broadcast %cst_73 : f32 to vector<8x128xf32>
    %144 = arith.maximumf %142, %143 : vector<8x128xf32>
    %145 = arith.subf %125, %144 : vector<8x128xf32>
    %146 = arith.mulf %141, %145 : vector<8x128xf32>
    %147 = arith.addf %144, %146 : vector<8x128xf32>
    %148 = arith.index_cast %c2_i32_66 : i32 to index
    %c0_74 = arith.constant 0 : index
    %c0_75 = arith.constant 0 : index
    %149 = vector.load %arg7[%148, %c0_74, %c0_75] : memref<8x8x128xf32, #tpu.memory_space<vmem>>, vector<1x8x128xf32>
    %150 = vector.shape_cast %149 : vector<1x8x128xf32> to vector<8x128xf32>
    %151 = vector.shape_cast %147 : vector<8x128xf32> to vector<1x8x128xf32>
    tpu.vector_store %arg7[%148, %c0_74, %c0_75], %151 {strides = array<i32>} : memref<8x8x128xf32, #tpu.memory_space<vmem>>, vector<1x8x128xf32>,
    %c3_i32_76 = arith.constant 3 : i32
    %152 = arith.index_cast %c3_i32_76 : i32 to index
    %c0_77 = arith.constant 0 : index
    %c0_78 = arith.constant 0 : index
    %153 = vector.load %arg9[%152, %c0_77, %c0_78] : memref<8x8x256xf32, #tpu.memory_space<vmem>>, vector<1x8x256xf32>
    %154 = vector.shape_cast %153 : vector<1x8x256xf32> to vector<8x256xf32>
    %c0_79 = arith.constant 0 : index
    %c0_80 = arith.constant 0 : index
    %155 = vector.load %arg5[%c0_79, %c0_80] : memref<128x256xf32, #tpu.memory_space<vmem>>, vector<128x256xf32>
    %cst_81 = arith.constant dense<0.000000e+00> : vector<8x256xf32>
    %156 = tpu.matmul %147, %155, %cst_81 {dimension_numbers = #tpu.dot_dimension_numbers<[1], [0], [0], [1], [0, 0, 1, 1], [], []>} : vector<8x128xf32>, vector<128x256xf32>, vector<8x256xf32> -> vector<8x256xf32>
    %157 = arith.addf %154, %156 : vector<8x256xf32>
    %158 = vector.extract_strided_slice %157 {offsets = [0, 0], sizes = [8, 128], strides = [1, 1]} : vector<8x256xf32> to vector<8x128xf32>
    %159 = arith.negf %158 : vector<8x128xf32>
    %160 = math.exp %159 : vector<8x128xf32>
    %cst_82 = arith.constant 1.000000e+00 : f32
    %161 = vector.broadcast %cst_82 : f32 to vector<8x128xf32>
    %162 = arith.addf %161, %160 : vector<8x128xf32>
    %163 = arith.divf %161, %162 : vector<8x128xf32>
    %164 = vector.extract_strided_slice %157 {offsets = [0, 128], sizes = [8, 128], strides = [1, 1]} : vector<8x256xf32> to vector<8x128xf32>
    %cst_83 = arith.constant 0.000000e+00 : f32
    %165 = vector.broadcast %cst_83 : f32 to vector<8x128xf32>
    %166 = arith.maximumf %164, %165 : vector<8x128xf32>
    %167 = arith.subf %147, %166 : vector<8x128xf32>
    %168 = arith.mulf %163, %167 : vector<8x128xf32>
    %169 = arith.addf %166, %168 : vector<8x128xf32>
    %170 = arith.index_cast %c3_i32_76 : i32 to index
    %c0_84 = arith.constant 0 : index
    %c0_85 = arith.constant 0 : index
    %171 = vector.load %arg7[%170, %c0_84, %c0_85] : memref<8x8x128xf32, #tpu.memory_space<vmem>>, vector<1x8x128xf32>
    %172 = vector.shape_cast %171 : vector<1x8x128xf32> to vector<8x128xf32>
    %173 = vector.shape_cast %169 : vector<8x128xf32> to vector<1x8x128xf32>
    tpu.vector_store %arg7[%170, %c0_84, %c0_85], %173 {strides = array<i32>} : memref<8x8x128xf32, #tpu.memory_space<vmem>>, vector<1x8x128xf32>,
    %c4_i32_86 = arith.constant 4 : i32
    %174 = arith.index_cast %c4_i32_86 : i32 to index
    %c0_87 = arith.constant 0 : index
    %c0_88 = arith.constant 0 : index
    %175 = vector.load %arg9[%174, %c0_87, %c0_88] : memref<8x8x256xf32, #tpu.memory_space<vmem>>, vector<1x8x256xf32>
    %176 = vector.shape_cast %175 : vector<1x8x256xf32> to vector<8x256xf32>
    %c0_89 = arith.constant 0 : index
    %c0_90 = arith.constant 0 : index
    %177 = vector.load %arg5[%c0_89, %c0_90] : memref<128x256xf32, #tpu.memory_space<vmem>>, vector<128x256xf32>
    %cst_91 = arith.constant dense<0.000000e+00> : vector<8x256xf32>
    %178 = tpu.matmul %169, %177, %cst_91 {dimension_numbers = #tpu.dot_dimension_numbers<[1], [0], [0], [1], [0, 0, 1, 1], [], []>} : vector<8x128xf32>, vector<128x256xf32>, vector<8x256xf32> -> vector<8x256xf32>
    %179 = arith.addf %176, %178 : vector<8x256xf32>
    %180 = vector.extract_strided_slice %179 {offsets = [0, 0], sizes = [8, 128], strides = [1, 1]} : vector<8x256xf32> to vector<8x128xf32>
    %181 = arith.negf %180 : vector<8x128xf32>
    %182 = math.exp %181 : vector<8x128xf32>
    %cst_92 = arith.constant 1.000000e+00 : f32
    %183 = vector.broadcast %cst_92 : f32 to vector<8x128xf32>
    %184 = arith.addf %183, %182 : vector<8x128xf32>
    %185 = arith.divf %183, %184 : vector<8x128xf32>
    %186 = vector.extract_strided_slice %179 {offsets = [0, 128], sizes = [8, 128], strides = [1, 1]} : vector<8x256xf32> to vector<8x128xf32>
    %cst_93 = arith.constant 0.000000e+00 : f32
    %187 = vector.broadcast %cst_93 : f32 to vector<8x128xf32>
    %188 = arith.maximumf %186, %187 : vector<8x128xf32>
    %189 = arith.subf %169, %188 : vector<8x128xf32>
    %190 = arith.mulf %185, %189 : vector<8x128xf32>
    %191 = arith.addf %188, %190 : vector<8x128xf32>
    %192 = arith.index_cast %c4_i32_86 : i32 to index
    %c0_94 = arith.constant 0 : index
    %c0_95 = arith.constant 0 : index
    %193 = vector.load %arg7[%192, %c0_94, %c0_95] : memref<8x8x128xf32, #tpu.memory_space<vmem>>, vector<1x8x128xf32>
    %194 = vector.shape_cast %193 : vector<1x8x128xf32> to vector<8x128xf32>
    %195 = vector.shape_cast %191 : vector<8x128xf32> to vector<1x8x128xf32>
    tpu.vector_store %arg7[%192, %c0_94, %c0_95], %195 {strides = array<i32>} : memref<8x8x128xf32, #tpu.memory_space<vmem>>, vector<1x8x128xf32>,
    %c5_i32_96 = arith.constant 5 : i32
    %196 = arith.index_cast %c5_i32_96 : i32 to index
    %c0_97 = arith.constant 0 : index
    %c0_98 = arith.constant 0 : index
    %197 = vector.load %arg9[%196, %c0_97, %c0_98] : memref<8x8x256xf32, #tpu.memory_space<vmem>>, vector<1x8x256xf32>
    %198 = vector.shape_cast %197 : vector<1x8x256xf32> to vector<8x256xf32>
    %c0_99 = arith.constant 0 : index
    %c0_100 = arith.constant 0 : index
    %199 = vector.load %arg5[%c0_99, %c0_100] : memref<128x256xf32, #tpu.memory_space<vmem>>, vector<128x256xf32>
    %cst_101 = arith.constant dense<0.000000e+00> : vector<8x256xf32>
    %200 = tpu.matmul %191, %199, %cst_101 {dimension_numbers = #tpu.dot_dimension_numbers<[1], [0], [0], [1], [0, 0, 1, 1], [], []>} : vector<8x128xf32>, vector<128x256xf32>, vector<8x256xf32> -> vector<8x256xf32>
    %201 = arith.addf %198, %200 : vector<8x256xf32>
    %202 = vector.extract_strided_slice %201 {offsets = [0, 0], sizes = [8, 128], strides = [1, 1]} : vector<8x256xf32> to vector<8x128xf32>
    %203 = arith.negf %202 : vector<8x128xf32>
    %204 = math.exp %203 : vector<8x128xf32>
    %cst_102 = arith.constant 1.000000e+00 : f32
    %205 = vector.broadcast %cst_102 : f32 to vector<8x128xf32>
    %206 = arith.addf %205, %204 : vector<8x128xf32>
    %207 = arith.divf %205, %206 : vector<8x128xf32>
    %208 = vector.extract_strided_slice %201 {offsets = [0, 128], sizes = [8, 128], strides = [1, 1]} : vector<8x256xf32> to vector<8x128xf32>
    %cst_103 = arith.constant 0.000000e+00 : f32
    %209 = vector.broadcast %cst_103 : f32 to vector<8x128xf32>
    %210 = arith.maximumf %208, %209 : vector<8x128xf32>
    %211 = arith.subf %191, %210 : vector<8x128xf32>
    %212 = arith.mulf %207, %211 : vector<8x128xf32>
    %213 = arith.addf %210, %212 : vector<8x128xf32>
    %214 = arith.index_cast %c5_i32_96 : i32 to index
    %c0_104 = arith.constant 0 : index
    %c0_105 = arith.constant 0 : index
    %215 = vector.load %arg7[%214, %c0_104, %c0_105] : memref<8x8x128xf32, #tpu.memory_space<vmem>>, vector<1x8x128xf32>
    %216 = vector.shape_cast %215 : vector<1x8x128xf32> to vector<8x128xf32>
    %217 = vector.shape_cast %213 : vector<8x128xf32> to vector<1x8x128xf32>
    tpu.vector_store %arg7[%214, %c0_104, %c0_105], %217 {strides = array<i32>} : memref<8x8x128xf32, #tpu.memory_space<vmem>>, vector<1x8x128xf32>,
    %c6_i32_106 = arith.constant 6 : i32
    %218 = arith.index_cast %c6_i32_106 : i32 to index
    %c0_107 = arith.constant 0 : index
    %c0_108 = arith.constant 0 : index
    %219 = vector.load %arg9[%218, %c0_107, %c0_108] : memref<8x8x256xf32, #tpu.memory_space<vmem>>, vector<1x8x256xf32>
    %220 = vector.shape_cast %219 : vector<1x8x256xf32> to vector<8x256xf32>
    %c0_109 = arith.constant 0 : index
    %c0_110 = arith.constant 0 : index
    %221 = vector.load %arg5[%c0_109, %c0_110] : memref<128x256xf32, #tpu.memory_space<vmem>>, vector<128x256xf32>
    %cst_111 = arith.constant dense<0.000000e+00> : vector<8x256xf32>
    %222 = tpu.matmul %213, %221, %cst_111 {dimension_numbers = #tpu.dot_dimension_numbers<[1], [0], [0], [1], [0, 0, 1, 1], [], []>} : vector<8x128xf32>, vector<128x256xf32>, vector<8x256xf32> -> vector<8x256xf32>
    %223 = arith.addf %220, %222 : vector<8x256xf32>
    %224 = vector.extract_strided_slice %223 {offsets = [0, 0], sizes = [8, 128], strides = [1, 1]} : vector<8x256xf32> to vector<8x128xf32>
    %225 = arith.negf %224 : vector<8x128xf32>
    %226 = math.exp %225 : vector<8x128xf32>
    %cst_112 = arith.constant 1.000000e+00 : f32
    %227 = vector.broadcast %cst_112 : f32 to vector<8x128xf32>
    %228 = arith.addf %227, %226 : vector<8x128xf32>
    %229 = arith.divf %227, %228 : vector<8x128xf32>
    %230 = vector.extract_strided_slice %223 {offsets = [0, 128], sizes = [8, 128], strides = [1, 1]} : vector<8x256xf32> to vector<8x128xf32>
    %cst_113 = arith.constant 0.000000e+00 : f32
    %231 = vector.broadcast %cst_113 : f32 to vector<8x128xf32>
    %232 = arith.maximumf %230, %231 : vector<8x128xf32>
    %233 = arith.subf %213, %232 : vector<8x128xf32>
    %234 = arith.mulf %229, %233 : vector<8x128xf32>
    %235 = arith.addf %232, %234 : vector<8x128xf32>
    %236 = arith.index_cast %c6_i32_106 : i32 to index
    %c0_114 = arith.constant 0 : index
    %c0_115 = arith.constant 0 : index
    %237 = vector.load %arg7[%236, %c0_114, %c0_115] : memref<8x8x128xf32, #tpu.memory_space<vmem>>, vector<1x8x128xf32>
    %238 = vector.shape_cast %237 : vector<1x8x128xf32> to vector<8x128xf32>
    %239 = vector.shape_cast %235 : vector<8x128xf32> to vector<1x8x128xf32>
    tpu.vector_store %arg7[%236, %c0_114, %c0_115], %239 {strides = array<i32>} : memref<8x8x128xf32, #tpu.memory_space<vmem>>, vector<1x8x128xf32>,
    %c7_i32_116 = arith.constant 7 : i32
    %240 = arith.index_cast %c7_i32_116 : i32 to index
    %c0_117 = arith.constant 0 : index
    %c0_118 = arith.constant 0 : index
    %241 = vector.load %arg9[%240, %c0_117, %c0_118] : memref<8x8x256xf32, #tpu.memory_space<vmem>>, vector<1x8x256xf32>
    %242 = vector.shape_cast %241 : vector<1x8x256xf32> to vector<8x256xf32>
    %c0_119 = arith.constant 0 : index
    %c0_120 = arith.constant 0 : index
    %243 = vector.load %arg5[%c0_119, %c0_120] : memref<128x256xf32, #tpu.memory_space<vmem>>, vector<128x256xf32>
    %cst_121 = arith.constant dense<0.000000e+00> : vector<8x256xf32>
    %244 = tpu.matmul %235, %243, %cst_121 {dimension_numbers = #tpu.dot_dimension_numbers<[1], [0], [0], [1], [0, 0, 1, 1], [], []>} : vector<8x128xf32>, vector<128x256xf32>, vector<8x256xf32> -> vector<8x256xf32>
    %245 = arith.addf %242, %244 : vector<8x256xf32>
    %246 = vector.extract_strided_slice %245 {offsets = [0, 0], sizes = [8, 128], strides = [1, 1]} : vector<8x256xf32> to vector<8x128xf32>
    %247 = arith.negf %246 : vector<8x128xf32>
    %248 = math.exp %247 : vector<8x128xf32>
    %cst_122 = arith.constant 1.000000e+00 : f32
    %249 = vector.broadcast %cst_122 : f32 to vector<8x128xf32>
    %250 = arith.addf %249, %248 : vector<8x128xf32>
    %251 = arith.divf %249, %250 : vector<8x128xf32>
    %252 = vector.extract_strided_slice %245 {offsets = [0, 128], sizes = [8, 128], strides = [1, 1]} : vector<8x256xf32> to vector<8x128xf32>
    %cst_123 = arith.constant 0.000000e+00 : f32
    %253 = vector.broadcast %cst_123 : f32 to vector<8x128xf32>
    %254 = arith.maximumf %252, %253 : vector<8x128xf32>
    %255 = arith.subf %235, %254 : vector<8x128xf32>
    %256 = arith.mulf %251, %255 : vector<8x128xf32>
    %257 = arith.addf %254, %256 : vector<8x128xf32>
    %258 = arith.index_cast %c7_i32_116 : i32 to index
    %c0_124 = arith.constant 0 : index
    %c0_125 = arith.constant 0 : index
    %259 = vector.load %arg7[%258, %c0_124, %c0_125] : memref<8x8x128xf32, #tpu.memory_space<vmem>>, vector<1x8x128xf32>
    %260 = vector.shape_cast %259 : vector<1x8x128xf32> to vector<8x128xf32>
    %261 = vector.shape_cast %257 : vector<8x128xf32> to vector<1x8x128xf32>
    tpu.vector_store %arg7[%258, %c0_124, %c0_125], %261 {strides = array<i32>} : memref<8x8x128xf32, #tpu.memory_space<vmem>>, vector<1x8x128xf32>,
    %c8_i32_126 = arith.constant 8 : i32
    %c0_127 = arith.constant 0 : index
    %c0_128 = arith.constant 0 : index
    %262 = vector.load %arg8[%c0_127, %c0_128] : memref<8x128xf32, #tpu.memory_space<vmem>>, vector<8x128xf32>
    tpu.vector_store %arg8[%c0_127, %c0_128], %257 {strides = array<i32>} : memref<8x128xf32, #tpu.memory_space<vmem>>, vector<8x128xf32>,
    return
  }
  func.func @transform_0(%arg0: i32, %arg1: i32) -> (i32, i32, i32) {
    %c0_i32 = arith.constant 0 : i32
    %c0_i32_0 = arith.constant 0 : i32
    return %arg1, %arg0, %c0_i32 : i32, i32, i32
  }
  func.func @transform_1(%arg0: i32, %arg1: i32) -> (i32, i32) {
    %c0_i32 = arith.constant 0 : i32
    %c0_i32_0 = arith.constant 0 : i32
    return %arg0, %c0_i32 : i32, i32
  }
  func.func @transform_2(%arg0: i32, %arg1: i32) -> (i32, i32) {
    %c0_i32 = arith.constant 0 : i32
    %c0_i32_0 = arith.constant 0 : i32
    %c0_i32_1 = arith.constant 0 : i32
    return %c0_i32, %c0_i32_0 : i32, i32
  }
  func.func @transform_3(%arg0: i32, %arg1: i32) -> (i32, i32) {
    %c0_i32 = arith.constant 0 : i32
    %c0_i32_0 = arith.constant 0 : i32
    %c0_i32_1 = arith.constant 0 : i32
    return %c0_i32, %c0_i32_0 : i32, i32
  }
  func.func @transform_4(%arg0: i32, %arg1: i32) -> (i32, i32) {
    %c0_i32 = arith.constant 0 : i32
    %c0_i32_0 = arith.constant 0 : i32
    %c0_i32_1 = arith.constant 0 : i32
    return %c0_i32, %c0_i32_0 : i32, i32
  }
  func.func @transform_5(%arg0: i32, %arg1: i32) -> (i32, i32, i32) {
    %c0_i32 = arith.constant 0 : i32
    %c0_i32_0 = arith.constant 0 : i32
    return %arg1, %arg0, %c0_i32 : i32, i32, i32
  }
}

</mosaic_0001>

<bundles_post_ra>
// kernel: tpu_custom_call.1
= control target key start
LH: loop header
LB: loop body
LE: loop exit
PB: predicated region body
PF: predicated region fallthrough
CT: control target
= control target key end

     0   :  { %10 = vsyncpa [#allocation5], 0  ;;  %s2504_s0 = inlined_call_operand.hbm [shape: f32[8,8,16], index: 0, kind: input, shape index: {}]   ;;  %s2505_s1 = inlined_call_operand.hbm [shape: f32[8,128], index: 1, kind: input, shape index: {}]   ;;  %s2506_s2 = inlined_call_operand.hbm [shape: f32[16,256], index: 2, kind: input, shape index: {}]   ;;  %s2507_s3 = inlined_call_operand.hbm [shape: f32[128,256], index: 3, kind: input, shape index: {}]   ;;  %s2508_s4 = inlined_call_operand.vmem [shape: f32[1,256], index: 4, kind: input, shape index: {}]   ;;  %s2509_s5 = inlined_call_operand.hbm [shape: f32[8,8,128], index: 5, kind: output, shape index: {}]  }
   0x1   :  { %11 = vsyncpa [#allocation8], 0 }
   0x2   :  { %12 = vsyncpa [#allocation11], 0 }
   0x3   :  { %13 = vsyncpa [#allocation6], 0  ;;  %s2195_s18 = smov [#allocation7]   ;;  %s2196_s20 = smov [#allocation4]  }
   0x4   :  { %s32_s19 = sshll.u32 %s2195_s18, 4  ;;  %s19_s21 = sshll.u32 %s2196_s20, 4  ;;  %s33_s19 = int_to_ptr.vmem [resolvable:$true] %s32_s19  ;;  %s2235_s21 = int_to_ptr.vmem [resolvable:$true] %s19_s21 }
   0x5   :  { %s2077_s24 = scalar_lea.hbm %s2505_s1, 128 }
   0x6   :  { %p2078_p0 = scmp.ne.s32.totalorder %s2505_s1, %s2077_s24  ;;  %p2081_p1 = scmp.lt.u32.totalorder %s2077_s24, %s2505_s1 }
   0x8   :  { %p2083_p2 = pnand %p2081_p1, %p2078_p0 }
   0xa   :  { %2086 = shalt.err (!%p2083_p2)
}
   0xb   :  { %s2087_s29 = scalar_lea.vmem %s33_s19, 128  ;;  %p2092_p4 = scmp.lt.s32.totalorder %s33_s19, %s33_s19 }
   0xc   :  { %p2088_p3 = scmp.ne.s32.totalorder %s33_s19, %s2087_s29  ;;  %p2093_p5 = scmp.lt.s32.totalorder %s2087_s29, %s2087_s29 }
   0xe   :  { %p2094_p6 = por %p2093_p5, %p2092_p4 }
  0x10   :  { %p2095_p7 = pnand %p2094_p6, %p2088_p3 }
  0x12   :  { %2098 = shalt.err (!%p2095_p7)
}
  0x13   :  { %35 = dma.hbm_to_vmem [thread:$0]  %s2505_s1, 128, %s33_s19, [#allocation8]  }
  0x14   :  { %s2099_s9 = scalar_lea.hbm %s2504_s0, 1024 }
  0x15   :  { %p2100_p8 = scmp.ne.s32.totalorder %s2504_s0, %s2099_s9  ;;  %p2103_p9 = scmp.lt.u32.totalorder %s2099_s9, %s2504_s0 }
  0x17   :  { %p2105_p10 = pnand %p2103_p9, %p2100_p8 }
  0x19   :  { %2108 = shalt.err (!%p2105_p10)
}
  0x1a   :  { %s2109_s14 = scalar_lea.vmem %s2235_s21, 1024  ;;  %p2114_p12 = scmp.lt.s32.totalorder %s2235_s21, %s2235_s21 }
  0x1b   :  { %p2110_p11 = scmp.ne.s32.totalorder %s2235_s21, %s2109_s14  ;;  %p2115_p13 = scmp.lt.s32.totalorder %s2109_s14, %s2109_s14 }
  0x1d   :  { %p2116_p0 = por %p2115_p13, %p2114_p12 }
  0x1f   :  { %p2117_p1 = pnand %p2116_p0, %p2110_p11 }
  0x21   :  { %2120 = shalt.err (!%p2117_p1)
}
  0x22   :  { %s2197_s1 = smov 128   ;;  %s2198_s15 = smov 8  }
  0x23   :  { %25 = dma.hbm_to_vmem [thread:$0]  %s2504_s0, 1024, %s2235_s21, [#allocation5], %s2197_s1, %s2197_s1, %s2198_s15  }
  0x24   :  { %s2199_s18 = smov [#allocation9]   ;;  %s2121_s23 = scalar_lea.hbm %s2506_s2, 512 }
  0x25   :  { %s41_s19 = sshll.u32 %s2199_s18, 4  ;;  %p2122_p2 = scmp.ne.s32.totalorder %s2506_s2, %s2121_s23  ;;  %s42_s19 = int_to_ptr.vmem [resolvable:$true] %s41_s19 }
  0x26   :  { %p2125_p3 = scmp.lt.u32.totalorder %s2121_s23, %s2506_s2 }
  0x28   :  { %p2127_p4 = pnand %p2125_p3, %p2122_p2 }
  0x2a   :  { %2130 = shalt.err (!%p2127_p4)
}
  0x2b   :  { %s2131_s28 = scalar_lea.vmem %s42_s19, 512  ;;  %p2136_p6 = scmp.lt.s32.totalorder %s42_s19, %s42_s19 }
  0x2c   :  { %p2132_p5 = scmp.ne.s32.totalorder %s42_s19, %s2131_s28  ;;  %p2137_p7 = scmp.lt.s32.totalorder %s2131_s28, %s2131_s28 }
  0x2e   :  { %p2138_p8 = por %p2137_p7, %p2136_p6 }
  0x30   :  { %p2139_p9 = pnand %p2138_p8, %p2132_p5 }
  0x32   :  { %2142 = shalt.err (!%p2139_p9)
}
  0x33   :  { %s2200_s0 = smov 256   ;;  %s2201_s21 = smov 16  }
  0x34   :  { %47 = dma.hbm_to_vmem [thread:$0]  %s2506_s2, 512, %s42_s19, [#allocation8], %s2200_s0, %s2200_s0, %s2201_s21  }
  0x35   :  { %s2202_s6 = smov [#allocation10]   ;;  %s2143_s10 = scalar_lea.hbm %s2507_s3, 4096 }
  0x36   :  { %s53_s7 = sshll.u32 %s2202_s6, 4  ;;  %p2144_p10 = scmp.ne.s32.totalorder %s2507_s3, %s2143_s10  ;;  %s54_s7 = int_to_ptr.vmem [resolvable:$true] %s53_s7 }
  0x37   :  { %p2147_p11 = scmp.lt.u32.totalorder %s2143_s10, %s2507_s3 }
  0x39   :  { %p2149_p12 = pnand %p2147_p11, %p2144_p10 }
  0x3b   :  { %2152 = shalt.err (!%p2149_p12)
}
  0x3c   :  { %s2153_s16 = scalar_lea.vmem %s54_s7, 4096  ;;  %p2158_p0 = scmp.lt.s32.totalorder %s54_s7, %s54_s7 }
  0x3d   :  { %p2154_p13 = scmp.ne.s32.totalorder %s54_s7, %s2153_s16  ;;  %p2159_p1 = scmp.lt.s32.totalorder %s2153_s16, %s2153_s16 }
  0x3f   :  { %p2160_p2 = por %p2159_p1, %p2158_p0 }
  0x41   :  { %p2161_p3 = pnand %p2160_p2, %p2154_p13 }
  0x43   :  { %2164 = shalt.err (!%p2161_p3)
}
  0x44   :  { %59 = dma.hbm_to_vmem [thread:$0]  %s2507_s3, 4096, %s54_s7, [#allocation11], %s2200_s0, %s2200_s0, %s2201_s21  }
  0x45   :  { %2187 = dma.done.wait [#allocation5], 1024  }
  0x46   :  { %2188 = vsyncadd [#allocation5], 4294966272 }
  0x47   :  { %2189 = dma.done.wait [#allocation8], 640  }
  0x48   :  { %2190 = vsyncadd [#allocation8], 4294966656 }
  0x49   :  { %2191 = dma.done.wait [#allocation11], 4096  }
  0x4a   :  { %2192 = vsyncadd [#allocation11], 4294963200  ;;  %v2203_v0 = vmov 0.0   ;;  %v81_v1 = vld [vmem:[#allocation9 + $0x8] sm:$0xff]  ;;  %v83_v2 = vld [vmem:[#allocation9 + $0x18] sm:$0xff]  ;;  %vm97_vm0 = vcmask 130048  }
  0x4b   :  { %165 = vmatprep.mubr.f32.mxu0 %v2203_v0  ;;  %243 = vmatprep.mubr.f32.mxu1 %v2203_v0  ;;  %v80_v3 = vld [vmem:[#allocation9] sm:$0xff]  ;;  %v1715_v4 = vpack.c.bf16 %v83_v2, %v81_v1  ;;  %v82_v5 = vld [vmem:[#allocation9 + $0x10] sm:$0xff]  ;;  %v85_v7 = vld [vmem:[#allocation4] sm:$0xff]  ;;  %v87_v1 = vlaneseq }
  0x4c   :  { %v1717_v6 = vpack.c.bf16 %v82_v5, %v80_v3  ;;  %v254_v8 = vld [vmem:[#allocation4 + $0x10] sm:$0xff]  ;;  %v733_v10 = vld [vmem:[#allocation10 + $0x18] sm:$0xff]  ;;  %v730_v13 = vld [vmem:[#allocation10] sm:$0xff] }
  0x4d   :  { %1716 = vmatprep.subr.bf16.mxu0 %v1715_v4  ;;  %1720 = vmatprep.subr.bf16.mxu1 %v1715_v4  ;;  %v731_v9 = vld [vmem:[#allocation10 + $0x8] sm:$0xff]  ;;  %v412_v11 = vld [vmem:[#allocation4 + $0x20] sm:$0xff]  ;;  %v732_v14 = vld [vmem:[#allocation10 + $0x10] sm:$0xff]  ;;  %v88_v2 = vshrl.u32 %v87_v1, 7 }
  0x4e   :  { %1718 = vmatpush1.bf16.msra.mxu0 %v1717_v6  ;;  %1722 = vmatpush1.bf16.msra.mxu1 %v1717_v6  ;;  %v2299_v12 = vpack.c.bf16 %v733_v10, %v731_v9  ;;  %v175_v15 = vld [vmem:[#allocation4 + $0x8] sm:$0xff]  ;;  %v735_v16 = vld [vmem:[#allocation10 + $0x28] sm:$0xff]  ;;  %v737_v17 = vld [vmem:[#allocation10 + $0x38] sm:$0xff]  ;;  %v2304_v20 = vpack.c.bf16 %v732_v14, %v730_v13 }
  0x4f   :  { %1724 = vmatprep.subr.bf16.mxu0 %v1715_v4  ;;  %1728 = vmatprep.subr.bf16.mxu1 %v1715_v4  ;;  %v333_v18 = vld [vmem:[#allocation4 + $0x18] sm:$0xff]  ;;  %v570_v19 = vld [vmem:[#allocation4 + $0x30] sm:$0xff]  ;;  %v2307_v21 = vpack.c.bf16 %v737_v17, %v735_v16  ;;  %v734_v22 = vld [vmem:[#allocation10 + $0x20] sm:$0xff]  ;;  %v89_v3 = vsub.s32 0, %v88_v2  ;;  %v93_v10 = vsub.s32 1, %v88_v2 }
  0x50   :  { %v736_v23 = vld [vmem:[#allocation10 + $0x30] sm:$0xff]  ;;  %v739_v24 = vld [vmem:[#allocation10 + $0x48] sm:$0xff]  ;;  %v741_v25 = vld [vmem:[#allocation10 + $0x58] sm:$0xff] }
  0x51   :  { %1699 = vmatmul.mubr.msk.f32.vlgmr.msra.gmra.mrb[0].mxu0 %vm97_vm0, %v85_v7  ;;  %1700 = vmatmul.mubr.msk.f32.vlgmr.msra.gmra.mrb[0].mxu1 %vm97_vm0, %v175_v15  ;;  %v491_v26 = vld [vmem:[#allocation4 + $0x28] sm:$0xff]  ;;  %v2313_v27 = vpack.c.bf16 %v736_v23, %v734_v22  ;;  %v2317_v28 = vpack.c.bf16 %v741_v25, %v739_v24  ;;  %v740_v30 = vld [vmem:[#allocation10 + $0x50] sm:$0xff]  ;;  %v743_v31 = vld [vmem:[#allocation10 + $0x68] sm:$0xff] }
  0x52   :  { %1726 = vmatpush1.bf16.msra.mxu0 %v1717_v6  ;;  %322 = vmatprep.mubr.f32.mxu0 %v2203_v0  ;;  %v738_v29 = vld [vmem:[#allocation10 + $0x40] sm:$0xff]  ;;  %v745_v32 = vld [vmem:[#allocation10 + $0x78] sm:$0xff]  ;;  %v744_v36 = vld [vmem:[#allocation10 + $0x70] sm:$0xff] }
  0x53   :  { %1732 = vmatprep.subr.bf16.mxu0 %v1715_v4  ;;  %1730 = vmatpush1.bf16.msra.mxu1 %v1717_v6  ;;  %v2323_v33 = vpack.c.bf16 %v740_v30, %v738_v29  ;;  %v2327_v34 = vpack.c.bf16 %v745_v32, %v743_v31  ;;  %v742_v35 = vld [vmem:[#allocation10 + $0x60] sm:$0xff]  ;;  %v747_v37 = vld [vmem:[#allocation10 + $0x88] sm:$0xff]  ;;  %v749_v38 = vld [vmem:[#allocation10 + $0x98] sm:$0xff] }
  0x54   :  { %401 = vmatprep.mubr.f32.mxu1 %v2203_v0  ;;  %1736 = vmatprep.subr.bf16.mxu1 %v1715_v4  ;;  %v2330_v39 = vpack.c.bf16 %v744_v36, %v742_v35  ;;  %v2333_v40 = vpack.c.bf16 %v749_v38, %v747_v37  ;;  %v746_v41 = vld [vmem:[#allocation10 + $0x80] sm:$0xff]  ;;  %v748_v42 = vld [vmem:[#allocation10 + $0x90] sm:$0xff]  ;;  %v751_v43 = vld [vmem:[#allocation10 + $0xa8] sm:$0xff] }
  0x55   :  { %1701 = vmatmul.mubr.msk.f32.vlgmr.msra.gmra.mrb[2].mxu0 %vm97_vm0, %v254_v8  ;;  %v753_v44 = vld [vmem:[#allocation10 + $0xb8] sm:$0xff]  ;;  %v2336_v45 = vpack.c.bf16 %v748_v42, %v746_v41  ;;  %v750_v47 = vld [vmem:[#allocation10 + $0xa0] sm:$0xff]  ;;  %v752_v48 = vld [vmem:[#allocation10 + $0xb0] sm:$0xff] }
  0x56   :  { %1734 = vmatpush1.bf16.msra.mxu0 %v1717_v6  ;;  %480 = vmatprep.mubr.f32.mxu0 %v2203_v0  ;;  %v2339_v46 = vpack.c.bf16 %v753_v44, %v751_v43  ;;  %v755_v49 = vld [vmem:[#allocation10 + $0xc8] sm:$0xff]  ;;  %v757_v50 = vld [vmem:[#allocation10 + $0xd8] sm:$0xff]  ;;  %v2342_v51 = vpack.c.bf16 %v752_v48, %v750_v47  ;;  %v754_v53 = vld [vmem:[#allocation10 + $0xc0] sm:$0xff] }
  0x57   :  { %1740 = vmatprep.subr.bf16.mxu0 %v1715_v4  ;;  %1702 = vmatmul.mubr.msk.f32.vlgmr.msra.gmra.mrb[2].mxu1 %vm97_vm0, %v333_v18  ;;  %v2345_v52 = vpack.c.bf16 %v757_v50, %v755_v49  ;;  %v756_v54 = vld [vmem:[#allocation10 + $0xd0] sm:$0xff]  ;;  %v759_v55 = vld [vmem:[#allocation10 + $0xe8] sm:$0xff]  ;;  %v761_v56 = vld [vmem:[#allocation10 + $0xf8] sm:$0xff] }
  0x58   :  { %1738 = vmatpush1.bf16.msra.mxu1 %v1717_v6  ;;  %559 = vmatprep.mubr.f32.mxu1 %v2203_v0  ;;  %v2348_v57 = vpack.c.bf16 %v756_v54, %v754_v53  ;;  %v2351_v58 = vpack.c.bf16 %v761_v56, %v759_v55  ;;  %v758_v59 = vld [vmem:[#allocation10 + $0xe0] sm:$0xff]  ;;  %v760_v60 = vld [vmem:[#allocation10 + $0xf0] sm:$0xff]  ;;  %v78_v62 = vld [vmem:[#allocation7] sm:$0xff] }
  0x59   :  { %1703 = vmatmul.mubr.msk.f32.vlgmr.msra.gmra.mrb[4].mxu0 %vm97_vm0, %v412_v11  ;;  %1744 = vmatprep.subr.bf16.mxu1 %v1715_v4  ;;  %v2354_v61 = vpack.c.bf16 %v760_v60, %v758_v59  ;;  %v649_v63 = vld [vmem:[#allocation4 + $0x38] sm:$0xff]  ;;  %v84_v4 = vld [vmem:[%s2508_s4] sm:$0x3]  ;;  %s2204_s4 = smov [#allocation12]  }
  0x5a   :  { %1742 = vmatpush1.bf16.msra.mxu0 %v1717_v6  ;;  %638 = vmatprep.mubr.f32.mxu0 %v2203_v0  ;;  %v2397_v5 = vrot.slane %v84_v4, %v89_v3  ;;  %v2400_v13 = vrot.slane %v84_v4, %v93_v10  ;;  %s1685_s19 = sshll.u32 %s2204_s4, 4  ;;  %s1686_s19 = int_to_ptr.vmem [resolvable:$true] %s1685_s19 }
  0x5b   :  { %1748 = vmatprep.subr.bf16.mxu0 %v2299_v12  ;;  %1704 = vmatmul.mubr.msk.f32.vlgmr.msra.gmra.mrb[4].mxu1 %vm97_vm0, %v491_v26  ;;  %s2165_s20 = scalar_lea.vmem %s1686_s19, 1024  ;;  %p2170_p5 = scmp.lt.s32.totalorder %s1686_s19, %s1686_s19 }
  0x5c   :  { %1746 = vmatpush1.bf16.msra.mxu1 %v1717_v6  ;;  %717 = vmatprep.mubr.f32.mxu1 %v2203_v0  ;;  %p2166_p4 = scmp.ne.s32.totalorder %s1686_s19, %s2165_s20  ;;  %p2171_p6 = scmp.lt.s32.totalorder %s2165_s20, %s2165_s20 }
  0x5d   :  { %1705 = vmatmul.mubr.msk.f32.vlgmr.msra.gmra.mrb[6].mxu0 %vm97_vm0, %v570_v19  ;;  %1780 = vmatprep.subr.bf16.mxu1 %v2299_v12 }
  0x5e   :  { %1750 = vmatpush1.bf16.msra.mxu0 %v2304_v20  ;;  %826 = vmatprep.mubr.f32.mxu0 %v2203_v0  ;;  %p2172_p7 = por %p2171_p6, %p2170_p5 }
  0x5f   :  { %1752 = vmatprep.subr.bf16.mxu0 %v2307_v21  ;;  %1706 = vmatmul.mubr.msk.f32.vlgmr.msra.gmra.mrb[6].mxu1 %vm97_vm0, %v649_v63 }
  0x60   :  { %1782 = vmatpush1.bf16.msra.mxu1 %v2304_v20  ;;  %944 = vmatprep.mubr.f32.mxu1 %v2203_v0  ;;  %p2173_p8 = pnand %p2172_p7, %p2166_p4 }
  0x61   :  { %1784 = vmatprep.subr.bf16.mxu1 %v2307_v21 }
  0x62   :  { %1754 = vmatpush1.bf16.msra.mxu0 %v2313_v27 }
  0x63   :  { %1756 = vmatprep.subr.bf16.mxu0 %v2317_v28 }
  0x64   :  { %1786 = vmatpush1.bf16.msra.mxu1 %v2313_v27 }
  0x65   :  { %1788 = vmatprep.subr.bf16.mxu1 %v2317_v28 }
  0x66   :  { %1758 = vmatpush1.bf16.msra.mxu0 %v2323_v33 }
  0x67   :  { %1760 = vmatprep.subr.bf16.mxu0 %v2327_v34 }
  0x68   :  { %1790 = vmatpush1.bf16.msra.mxu1 %v2323_v33 }
  0x69   :  { %1792 = vmatprep.subr.bf16.mxu1 %v2327_v34 }
  0x6a   :  { %1762 = vmatpush1.bf16.msra.mxu0 %v2330_v39 }
  0x6b   :  { %1764 = vmatprep.subr.bf16.mxu0 %v2333_v40 }
  0x6c   :  { %1794 = vmatpush1.bf16.msra.mxu1 %v2330_v39 }
  0x6d   :  { %1796 = vmatprep.subr.bf16.mxu1 %v2333_v40 }
  0x6e   :  { %1766 = vmatpush1.bf16.msra.mxu0 %v2336_v45 }
  0x6f   :  { %1768 = vmatprep.subr.bf16.mxu0 %v2339_v46 }
  0x70   :  { %1798 = vmatpush1.bf16.msra.mxu1 %v2336_v45 }
  0x71   :  { %1800 = vmatprep.subr.bf16.mxu1 %v2339_v46 }
  0x72   :  { %1770 = vmatpush1.bf16.msra.mxu0 %v2342_v51 }
  0x73   :  { %1772 = vmatprep.subr.bf16.mxu0 %v2345_v52 }
  0x74   :  { %1802 = vmatpush1.bf16.msra.mxu1 %v2342_v51 }
  0x75   :  { %1804 = vmatprep.subr.bf16.mxu1 %v2345_v52 }
  0x76   :  { %1774 = vmatpush1.bf16.msra.mxu0 %v2348_v57 }
  0x77   :  { %1776 = vmatprep.subr.bf16.mxu0 %v2351_v58 }
  0x78   :  { %1806 = vmatpush1.bf16.msra.mxu1 %v2348_v57 }
  0x79   :  { %1808 = vmatprep.subr.bf16.mxu1 %v2351_v58 }
  0x7a   :  { %1778 = vmatpush1.bf16.msra.mxu0 %v2354_v61 }
  0x7b   :  { %1812 = vmatprep.subr.bf16.mxu0 %v2299_v12 }
  0x7c   :  { %1810 = vmatpush1.bf16.msra.mxu1 %v2354_v61 }
  0x7d   :  { %827 = vmatmul.mubr.f32.vlgmr.msra.gmra.mrb[0].mxu0 %v78_v62  ;;  %1844 = vmatprep.subr.bf16.mxu1 %v2299_v12 }
  0x7e   :  { %1814 = vmatpush1.bf16.msra.mxu0 %v2304_v20  ;;  %1063 = vmatprep.mubr.f32.mxu0 %v2203_v0 }
  0x7f   :  { %1816 = vmatprep.subr.bf16.mxu0 %v2307_v21 }
  0x82   :  { %1818 = vmatpush1.bf16.msra.mxu0 %v2313_v27 }
  0x83   :  { %1820 = vmatprep.subr.bf16.mxu0 %v2317_v28 }
  0x86   :  { %1822 = vmatpush1.bf16.msra.mxu0 %v2323_v33 }
  0x87   :  { %1824 = vmatprep.subr.bf16.mxu0 %v2327_v34 }
  0x8a   :  { %1826 = vmatpush1.bf16.msra.mxu0 %v2330_v39 }
  0x8b   :  { %1828 = vmatprep.subr.bf16.mxu0 %v2333_v40 }
  0x8e   :  { %1830 = vmatpush1.bf16.msra.mxu0 %v2336_v45 }
  0x8f   :  { %1832 = vmatprep.subr.bf16.mxu0 %v2339_v46 }
  0x92   :  { %1834 = vmatpush1.bf16.msra.mxu0 %v2342_v51 }
  0x93   :  { %1836 = vmatprep.subr.bf16.mxu0 %v2345_v52 }
  0x96   :  { %1838 = vmatpush1.bf16.msra.mxu0 %v2348_v57 }
  0x97   :  { %1840 = vmatprep.subr.bf16.mxu0 %v2351_v58 }
  0x9a   :  { %1842 = vmatpush1.bf16.msra.mxu0 %v2354_v61 }
  0x9b   :  { %1876 = vmatprep.subr.bf16.mxu0 %v2299_v12 }
 0x150   :  { %v828_v6 = vpop.f32.mrb[0].mxu0 }
 0x151   :  { %v2003_v7 = vadd.f32 %v828_v6, %v2397_v5  ;;  %v830_v8 = vpop.f32.mrb[1].mxu0 }
 0x152   :  { %v2004_v15 = vadd.f32 %v830_v8, %v2400_v13 }
 0x153   :  { %v1707_v9 = vmul.f32 -1.442695, %v2003_v7 }
 0x154   :  { %v841_v16 = vmax.f32 %v2004_v15, 0.0 }
 0x155   :  { %2045 = vpow2.f32 %v1707_v9 }
 0x156   :  { %v842_v17 = vsub.f32 %v78_v62, %v841_v16 }
 0x15f   :  { %v2046_v11 = vpop.eup %2045 }
 0x160   :  { %v838_v14 = vadd.f32 1.0, %v2046_v11 }
 0x162   :  { %2047 = vrcp.f32 %v838_v14 }
 0x16c   :  { %v2048_v18 = vpop.eup %2047 }
 0x16d   :  { %v843_v19 = vmul.f32 %v2048_v18, %v842_v17 }
 0x16f   :  { %v844_v22 = vadd.f32 %v843_v19, %v841_v16 }
 0x171   :  { %845 = vst [vmem:[#allocation12] sm:$0xff] %v844_v22  ;;  %945 = vmatmul.mubr.f32.vlgmr.msra.gmra.mrb[0].mxu1 %v844_v22 }
 0x172   :  { %1846 = vmatpush1.bf16.msra.mxu1 %v2304_v20  ;;  %1182 = vmatprep.mubr.f32.mxu1 %v2203_v0 }
 0x173   :  { %1848 = vmatprep.subr.bf16.mxu1 %v2307_v21 }
 0x176   :  { %1850 = vmatpush1.bf16.msra.mxu1 %v2313_v27 }
 0x177   :  { %1852 = vmatprep.subr.bf16.mxu1 %v2317_v28 }
 0x17a   :  { %1854 = vmatpush1.bf16.msra.mxu1 %v2323_v33 }
 0x17b   :  { %1856 = vmatprep.subr.bf16.mxu1 %v2327_v34 }
 0x17e   :  { %1858 = vmatpush1.bf16.msra.mxu1 %v2330_v39 }
 0x17f   :  { %1860 = vmatprep.subr.bf16.mxu1 %v2333_v40 }
 0x182   :  { %1862 = vmatpush1.bf16.msra.mxu1 %v2336_v45 }
 0x183   :  { %1864 = vmatprep.subr.bf16.mxu1 %v2339_v46 }
 0x186   :  { %1866 = vmatpush1.bf16.msra.mxu1 %v2342_v51 }
 0x187   :  { %1868 = vmatprep.subr.bf16.mxu1 %v2345_v52 }
 0x18a   :  { %1870 = vmatpush1.bf16.msra.mxu1 %v2348_v57 }
 0x18b   :  { %1872 = vmatprep.subr.bf16.mxu1 %v2351_v58 }
 0x18e   :  { %1874 = vmatpush1.bf16.msra.mxu1 %v2354_v61 }
 0x18f   :  { %1908 = vmatprep.subr.bf16.mxu1 %v2299_v12 }
 0x244   :  { %v946_v23 = vpop.f32.mrb[0].mxu1 }
 0x245   :  { %v2005_v24 = vadd.f32 %v946_v23, %v2397_v5  ;;  %v948_v25 = vpop.f32.mrb[1].mxu1 }
 0x246   :  { %v2006_v31 = vadd.f32 %v948_v25, %v2400_v13  ;;  %v1564_v25 = vld [vmem:[#allocation10 + $0x10] sm:$0xff] }
 0x247   :  { %v1708_v26 = vmul.f32 -1.442695, %v2005_v24  ;;  %v1562_v24 = vld [vmem:[#allocation10] sm:$0xff] }
 0x248   :  { %v959_v32 = vmax.f32 %v2006_v31, 0.0 }
 0x249   :  { %2049 = vpow2.f32 %v1708_v26  ;;  %v1973_v26 = vpack.c.bf16 %v1564_v25, %v1562_v24 }
 0x24a   :  { %v960_v35 = vsub.f32 %v844_v22, %v959_v32  ;;  %v1565_v22 = vld [vmem:[#allocation10 + $0x18] sm:$0xff] }
 0x253   :  { %v2050_v29 = vpop.eup %2049 }
 0x254   :  { %v956_v30 = vadd.f32 1.0, %v2050_v29  ;;  %v1567_v29 = vld [vmem:[#allocation10 + $0x28] sm:$0xff] }
 0x256   :  { %2051 = vrcp.f32 %v956_v30  ;;  %v1569_v30 = vld [vmem:[#allocation10 + $0x38] sm:$0xff] }
 0x257   :  { %v1975_v31 = vpack.c.bf16 %v1569_v30, %v1567_v29 }
 0x260   :  { %v2052_v36 = vpop.eup %2051 }
 0x261   :  { %v961_v37 = vmul.f32 %v2052_v36, %v960_v35  ;;  %v1568_v35 = vld [vmem:[#allocation10 + $0x30] sm:$0xff] }
 0x263   :  { %v962_v38 = vadd.f32 %v961_v37, %v959_v32  ;;  %v1566_v32 = vld [vmem:[#allocation10 + $0x20] sm:$0xff]  ;;  %v1571_v37 = vld [vmem:[#allocation10 + $0x48] sm:$0xff] }
 0x264   :  { %v1977_v36 = vpack.c.bf16 %v1568_v35, %v1566_v32 }
 0x265   :  { %964 = vst [vmem:[#allocation12 + $0x8] sm:$0xff] %v962_v38  ;;  %1064 = vmatmul.mubr.f32.vlgmr.msra.gmra.mrb[2].mxu0 %v962_v38 }
 0x266   :  { %1878 = vmatpush1.bf16.msra.mxu0 %v2304_v20  ;;  %1301 = vmatprep.mubr.f32.mxu0 %v2203_v0 }
 0x267   :  { %1880 = vmatprep.subr.bf16.mxu0 %v2307_v21 }
 0x26a   :  { %1882 = vmatpush1.bf16.msra.mxu0 %v2313_v27 }
 0x26b   :  { %1884 = vmatprep.subr.bf16.mxu0 %v2317_v28 }
 0x26e   :  { %1886 = vmatpush1.bf16.msra.mxu0 %v2323_v33 }
 0x26f   :  { %1888 = vmatprep.subr.bf16.mxu0 %v2327_v34 }
 0x272   :  { %1890 = vmatpush1.bf16.msra.mxu0 %v2330_v39 }
 0x273   :  { %1892 = vmatprep.subr.bf16.mxu0 %v2333_v40 }
 0x276   :  { %1894 = vmatpush1.bf16.msra.mxu0 %v2336_v45 }
 0x277   :  { %1896 = vmatprep.subr.bf16.mxu0 %v2339_v46 }
 0x27a   :  { %1898 = vmatpush1.bf16.msra.mxu0 %v2342_v51 }
 0x27b   :  { %1900 = vmatprep.subr.bf16.mxu0 %v2345_v52 }
 0x27e   :  { %1902 = vmatpush1.bf16.msra.mxu0 %v2348_v57 }
 0x27f   :  { %1904 = vmatprep.subr.bf16.mxu0 %v2351_v58 }
 0x282   :  { %1906 = vmatpush1.bf16.msra.mxu0 %v2354_v61 }
 0x283   :  { %1940 = vmatprep.subr.bf16.mxu0 %v2299_v12 }
 0x338   :  { %v1065_v41 = vpop.f32.mrb[2].mxu0 }
 0x339   :  { %v2007_v42 = vadd.f32 %v1065_v41, %v2397_v5  ;;  %v1067_v43 = vpop.f32.mrb[3].mxu0 }
 0x33a   :  { %v2008_v49 = vadd.f32 %v1067_v43, %v2400_v13  ;;  %v1572_v43 = vld [vmem:[#allocation10 + $0x50] sm:$0xff] }
 0x33b   :  { %v1709_v44 = vmul.f32 -1.442695, %v2007_v42  ;;  %v1570_v42 = vld [vmem:[#allocation10 + $0x40] sm:$0xff] }
 0x33c   :  { %v1078_v50 = vmax.f32 %v2008_v49, 0.0 }
 0x33d   :  { %2053 = vpow2.f32 %v1709_v44  ;;  %v1981_v44 = vpack.c.bf16 %v1572_v43, %v1570_v42 }
 0x33e   :  { %v1079_v53 = vsub.f32 %v962_v38, %v1078_v50  ;;  %v1573_v38 = vld [vmem:[#allocation10 + $0x58] sm:$0xff] }
 0x33f   :  { %v1979_v41 = vpack.c.bf16 %v1573_v38, %v1571_v37 }
 0x347   :  { %v2054_v47 = vpop.eup %2053 }
 0x348   :  { %v1075_v48 = vadd.f32 1.0, %v2054_v47  ;;  %v1575_v47 = vld [vmem:[#allocation10 + $0x68] sm:$0xff] }
 0x34a   :  { %2055 = vrcp.f32 %v1075_v48  ;;  %v1577_v48 = vld [vmem:[#allocation10 + $0x78] sm:$0xff] }
 0x34b   :  { %v1983_v49 = vpack.c.bf16 %v1577_v48, %v1575_v47 }
 0x354   :  { %v2056_v54 = vpop.eup %2055 }
 0x355   :  { %v1080_v55 = vmul.f32 %v2056_v54, %v1079_v53  ;;  %v1576_v53 = vld [vmem:[#allocation10 + $0x70] sm:$0xff] }
 0x357   :  { %v1081_v56 = vadd.f32 %v1080_v55, %v1078_v50  ;;  %v1574_v50 = vld [vmem:[#allocation10 + $0x60] sm:$0xff]  ;;  %v1579_v55 = vld [vmem:[#allocation10 + $0x88] sm:$0xff] }
 0x358   :  { %v1985_v54 = vpack.c.bf16 %v1576_v53, %v1574_v50 }
 0x359   :  { %1083 = vst [vmem:[#allocation12 + $0x10] sm:$0xff] %v1081_v56  ;;  %1183 = vmatmul.mubr.f32.vlgmr.msra.gmra.mrb[2].mxu1 %v1081_v56 }
 0x35a   :  { %1910 = vmatpush1.bf16.msra.mxu1 %v2304_v20  ;;  %1420 = vmatprep.mubr.f32.mxu1 %v2203_v0 }
 0x35b   :  { %1912 = vmatprep.subr.bf16.mxu1 %v2307_v21 }
 0x35e   :  { %1914 = vmatpush1.bf16.msra.mxu1 %v2313_v27 }
 0x35f   :  { %1916 = vmatprep.subr.bf16.mxu1 %v2317_v28 }
 0x362   :  { %1918 = vmatpush1.bf16.msra.mxu1 %v2323_v33 }
 0x363   :  { %1920 = vmatprep.subr.bf16.mxu1 %v2327_v34 }
 0x366   :  { %1922 = vmatpush1.bf16.msra.mxu1 %v2330_v39 }
 0x367   :  { %1924 = vmatprep.subr.bf16.mxu1 %v2333_v40 }
 0x36a   :  { %1926 = vmatpush1.bf16.msra.mxu1 %v2336_v45 }
 0x36b   :  { %1928 = vmatprep.subr.bf16.mxu1 %v2339_v46 }
 0x36e   :  { %1930 = vmatpush1.bf16.msra.mxu1 %v2342_v51 }
 0x36f   :  { %1932 = vmatprep.subr.bf16.mxu1 %v2345_v52 }
 0x372   :  { %1934 = vmatpush1.bf16.msra.mxu1 %v2348_v57 }
 0x373   :  { %1936 = vmatprep.subr.bf16.mxu1 %v2351_v58 }
 0x376   :  { %1938 = vmatpush1.bf16.msra.mxu1 %v2354_v61 }
 0x42c   :  { %v1184_v12 = vpop.f32.mrb[2].mxu1 }
 0x42d   :  { %v2009_v59 = vadd.f32 %v1184_v12, %v2397_v5  ;;  %v1186_v60 = vpop.f32.mrb[3].mxu1 }
 0x42e   :  { %v2010_v2 = vadd.f32 %v1186_v60, %v2400_v13  ;;  %v1580_v60 = vld [vmem:[#allocation10 + $0x90] sm:$0xff] }
 0x42f   :  { %v1710_v62 = vmul.f32 -1.442695, %v2009_v59  ;;  %v1578_v59 = vld [vmem:[#allocation10 + $0x80] sm:$0xff] }
 0x430   :  { %v1197_v3 = vmax.f32 %v2010_v2, 0.0 }
 0x431   :  { %2057 = vpow2.f32 %v1710_v62  ;;  %v1989_v62 = vpack.c.bf16 %v1580_v60, %v1578_v59 }
 0x432   :  { %v1198_v4 = vsub.f32 %v1081_v56, %v1197_v3  ;;  %v1581_v56 = vld [vmem:[#allocation10 + $0x98] sm:$0xff] }
 0x433   :  { %v1987_v12 = vpack.c.bf16 %v1581_v56, %v1579_v55 }
 0x43b   :  { %v2058_v63 = vpop.eup %2057 }
 0x43c   :  { %v1194_v1 = vadd.f32 1.0, %v2058_v63  ;;  %v1583_v63 = vld [vmem:[#allocation10 + $0xa8] sm:$0xff] }
 0x43e   :  { %2059 = vrcp.f32 %v1194_v1  ;;  %v1585_v1 = vld [vmem:[#allocation10 + $0xb8] sm:$0xff] }
 0x43f   :  { %v1991_v2 = vpack.c.bf16 %v1585_v1, %v1583_v63 }
 0x448   :  { %v2060_v6 = vpop.eup %2059 }
 0x449   :  { %v1199_v7 = vmul.f32 %v2060_v6, %v1198_v4  ;;  %v1584_v4 = vld [vmem:[#allocation10 + $0xb0] sm:$0xff] }
 0x44b   :  { %v1200_v8 = vadd.f32 %v1199_v7, %v1197_v3  ;;  %v1582_v3 = vld [vmem:[#allocation10 + $0xa0] sm:$0xff]  ;;  %v1587_v7 = vld [vmem:[#allocation10 + $0xc8] sm:$0xff] }
 0x44c   :  { %v1993_v6 = vpack.c.bf16 %v1584_v4, %v1582_v3 }
 0x44d   :  { %1202 = vst [vmem:[#allocation12 + $0x18] sm:$0xff] %v1200_v8  ;;  %1302 = vmatmul.mubr.f32.vlgmr.msra.gmra.mrb[4].mxu0 %v1200_v8 }
 0x44e   :  { %1942 = vmatpush1.bf16.msra.mxu0 %v2304_v20  ;;  %1539 = vmatprep.mubr.f32.mxu0 %v2203_v0 }
 0x44f   :  { %1944 = vmatprep.subr.bf16.mxu0 %v2307_v21 }
 0x452   :  { %1946 = vmatpush1.bf16.msra.mxu0 %v2313_v27 }
 0x453   :  { %1948 = vmatprep.subr.bf16.mxu0 %v2317_v28 }
 0x456   :  { %1950 = vmatpush1.bf16.msra.mxu0 %v2323_v33 }
 0x457   :  { %1952 = vmatprep.subr.bf16.mxu0 %v2327_v34 }
 0x45a   :  { %1954 = vmatpush1.bf16.msra.mxu0 %v2330_v39 }
 0x45b   :  { %1956 = vmatprep.subr.bf16.mxu0 %v2333_v40 }
 0x45e   :  { %1958 = vmatpush1.bf16.msra.mxu0 %v2336_v45 }
 0x45f   :  { %1960 = vmatprep.subr.bf16.mxu0 %v2339_v46 }
 0x462   :  { %1962 = vmatpush1.bf16.msra.mxu0 %v2342_v51 }
 0x463   :  { %1964 = vmatprep.subr.bf16.mxu0 %v2345_v52 }
 0x466   :  { %1966 = vmatpush1.bf16.msra.mxu0 %v2348_v57 }
 0x467   :  { %1968 = vmatprep.subr.bf16.mxu0 %v2351_v58 }
 0x46a   :  { %1970 = vmatpush1.bf16.msra.mxu0 %v2354_v61 }
 0x520   :  { %v1303_v20 = vpop.f32.mrb[4].mxu0 }
 0x521   :  { %v2011_v21 = vadd.f32 %v1303_v20, %v2397_v5  ;;  %v1305_v27 = vpop.f32.mrb[5].mxu0 }
 0x522   :  { %v2012_v39 = vadd.f32 %v1305_v27, %v2400_v13  ;;  %v1588_v27 = vld [vmem:[#allocation10 + $0xd0] sm:$0xff] }
 0x523   :  { %v1711_v28 = vmul.f32 -1.442695, %v2011_v21  ;;  %v1586_v21 = vld [vmem:[#allocation10 + $0xc0] sm:$0xff] }
 0x524   :  { %v1316_v40 = vmax.f32 %v2012_v39, 0.0 }
 0x525   :  { %2061 = vpow2.f32 %v1711_v28  ;;  %v1997_v28 = vpack.c.bf16 %v1588_v27, %v1586_v21 }
 0x526   :  { %v1317_v45 = vsub.f32 %v1200_v8, %v1316_v40  ;;  %v1589_v8 = vld [vmem:[#allocation10 + $0xd8] sm:$0xff] }
 0x527   :  { %v1995_v20 = vpack.c.bf16 %v1589_v8, %v1587_v7 }
 0x52f   :  { %v2062_v33 = vpop.eup %2061 }
 0x530   :  { %v1313_v34 = vadd.f32 1.0, %v2062_v33  ;;  %v1591_v33 = vld [vmem:[#allocation10 + $0xe8] sm:$0xff] }
 0x532   :  { %2063 = vrcp.f32 %v1313_v34  ;;  %v1593_v34 = vld [vmem:[#allocation10 + $0xf8] sm:$0xff] }
 0x533   :  { %v1999_v39 = vpack.c.bf16 %v1593_v34, %v1591_v33 }
 0x53c   :  { %v2064_v46 = vpop.eup %2063 }
 0x53d   :  { %v1318_v51 = vmul.f32 %v2064_v46, %v1317_v45  ;;  %v1592_v45 = vld [vmem:[#allocation10 + $0xf0] sm:$0xff] }
 0x53f   :  { %v1319_v52 = vadd.f32 %v1318_v51, %v1316_v40  ;;  %v1590_v40 = vld [vmem:[#allocation10 + $0xe0] sm:$0xff] }
 0x540   :  { %v2001_v46 = vpack.c.bf16 %v1592_v45, %v1590_v40 }
 0x541   :  { %1321 = vst [vmem:[#allocation12 + $0x20] sm:$0xff] %v1319_v52  ;;  %1421 = vmatmul.mubr.f32.vlgmr.msra.gmra.mrb[4].mxu1 %v1319_v52 }
 0x542   :  { %1658 = vmatprep.mubr.f32.mxu1 %v2203_v0  ;;  %v1563_v0 = vld [vmem:[#allocation10 + $0x8] sm:$0xff] }
 0x543   :  { %v1971_v23 = vpack.c.bf16 %v1565_v22, %v1563_v0 }
 0x545   :  { %1972 = vmatprep.subr.bf16.mxu1 %v1971_v23 }
 0x546   :  { %1974 = vmatpush1.bf16.msra.mxu1 %v1973_v26 }
 0x547   :  { %1976 = vmatprep.subr.bf16.mxu1 %v1975_v31 }
 0x54a   :  { %1978 = vmatpush1.bf16.msra.mxu1 %v1977_v36 }
 0x54b   :  { %1980 = vmatprep.subr.bf16.mxu1 %v1979_v41 }
 0x54e   :  { %1982 = vmatpush1.bf16.msra.mxu1 %v1981_v44 }
 0x54f   :  { %1984 = vmatprep.subr.bf16.mxu1 %v1983_v49 }
 0x552   :  { %1986 = vmatpush1.bf16.msra.mxu1 %v1985_v54 }
 0x553   :  { %1988 = vmatprep.subr.bf16.mxu1 %v1987_v12 }
 0x556   :  { %1990 = vmatpush1.bf16.msra.mxu1 %v1989_v62 }
 0x557   :  { %1992 = vmatprep.subr.bf16.mxu1 %v1991_v2 }
 0x55a   :  { %1994 = vmatpush1.bf16.msra.mxu1 %v1993_v6 }
 0x55b   :  { %1996 = vmatprep.subr.bf16.mxu1 %v1995_v20 }
 0x55e   :  { %1998 = vmatpush1.bf16.msra.mxu1 %v1997_v28 }
 0x55f   :  { %2000 = vmatprep.subr.bf16.mxu1 %v1999_v39 }
 0x562   :  { %2002 = vmatpush1.bf16.msra.mxu1 %v2001_v46 }
 0x614   :  { %v1422_v57 = vpop.f32.mrb[4].mxu1 }
 0x615   :  { %v2013_v58 = vadd.f32 %v1422_v57, %v2397_v5  ;;  %v1424_v61 = vpop.f32.mrb[5].mxu1 }
 0x616   :  { %v2014_v14 = vadd.f32 %v1424_v61, %v2400_v13 }
 0x617   :  { %v1712_v9 = vmul.f32 -1.442695, %v2013_v58 }
 0x618   :  { %v1435_v15 = vmax.f32 %v2014_v14, 0.0 }
 0x619   :  { %2065 = vpow2.f32 %v1712_v9 }
 0x61a   :  { %v1436_v16 = vsub.f32 %v1319_v52, %v1435_v15 }
 0x623   :  { %v2066_v10 = vpop.eup %2065 }
 0x624   :  { %v1432_v11 = vadd.f32 1.0, %v2066_v10 }
 0x626   :  { %2067 = vrcp.f32 %v1432_v11 }
 0x630   :  { %v2068_v17 = vpop.eup %2067 }
 0x631   :  { %v1437_v18 = vmul.f32 %v2068_v17, %v1436_v16 }
 0x633   :  { %v2480_v19 = vadd.f32 %v1437_v18, %v1435_v15 }
 0x635   :  { %1440 = vst [vmem:[#allocation12 + $0x28] sm:$0xff] %v2480_v19  ;;  %1540 = vmatmul.mubr.f32.vlgmr.msra.gmra.mrb[6].mxu0 %v2480_v19 }
 0x708   :  { %v1541_v51 = vpop.f32.mrb[6].mxu0 }
 0x709   :  { %v2015_v52 = vadd.f32 %v1541_v51, %v2397_v5  ;;  %v1543_v57 = vpop.f32.mrb[7].mxu0 }
 0x70a   :  { %v2016_v10 = vadd.f32 %v1543_v57, %v2400_v13 }
 0x70b   :  { %v1713_v58 = vmul.f32 -1.442695, %v2015_v52 }
 0x70c   :  { %v1554_v11 = vmax.f32 %v2016_v10, 0.0 }
 0x70d   :  { %2069 = vpow2.f32 %v1713_v58 }
 0x70e   :  { %v1555_v14 = vsub.f32 %v2480_v19, %v1554_v11 }
 0x717   :  { %v2070_v61 = vpop.eup %2069 }
 0x718   :  { %v1551_v9 = vadd.f32 1.0, %v2070_v61 }
 0x71a   :  { %2071 = vrcp.f32 %v1551_v9 }
 0x724   :  { %v2072_v15 = vpop.eup %2071 }
 0x725   :  { %v1556_v16 = vmul.f32 %v2072_v15, %v1555_v14 }
 0x727   :  { %v1557_v17 = vadd.f32 %v1556_v16, %v1554_v11 }
 0x729   :  { %1559 = vst [vmem:[#allocation12 + $0x30] sm:$0xff] %v1557_v17  ;;  %1659 = vmatmul.mubr.f32.vlgmr.msra.gmra.mrb[6].mxu1 %v1557_v17 }
 0x7fc   :  { %v1660_v18 = vpop.f32.mrb[6].mxu1 }
 0x7fd   :  { %v2017_v0 = vadd.f32 %v1660_v18, %v2397_v5  ;;  %v1662_v22 = vpop.f32.mrb[7].mxu1 }
 0x7fe   :  { %v2018_v26 = vadd.f32 %v1662_v22, %v2400_v13 }
 0x7ff   :  { %v1714_v23 = vmul.f32 -1.442695, %v2017_v0 }
 0x800   :  { %v1673_v29 = vmax.f32 %v2018_v26, 0.0 }
 0x801   :  { %2073 = vpow2.f32 %v1714_v23 }
 0x802   :  { %v1674_v30 = vsub.f32 %v1557_v17, %v1673_v29 }
 0x80b   :  { %v2074_v24 = vpop.eup %2073 }
 0x80c   :  { %v1670_v25 = vadd.f32 1.0, %v2074_v24 }
 0x80e   :  { %2075 = vrcp.f32 %v1670_v25 }
 0x818   :  { %v2076_v31 = vpop.eup %2075 }
 0x819   :  { %v1675_v19 = vmul.f32 %v2076_v31, %v1674_v30 }
 0x81b   :  { %v1676_v32 = vadd.f32 %v1675_v19, %v1673_v29 }
 0x81d   :  { %1678 = vst [vmem:[#allocation12 + $0x38] sm:$0xff] %v1676_v32 }
 0x81e   :  { %2176 = shalt.err (!%p2173_p8)
}
 0x81f   :  { %s2177_s24 = scalar_lea.hbm %s2509_s5, 1024 }
 0x820   :  { %p2178_p9 = scmp.ne.s32.totalorder %s2509_s5, %s2177_s24  ;;  %p2181_p10 = scmp.lt.u32.totalorder %s2177_s24, %s2509_s5 }
 0x822   :  { %p2183_p11 = pnand %p2181_p10, %p2178_p9 }
 0x824   :  { %2186 = shalt.err (!%p2183_p11)
}
 0x825   :  { %1691 = dma.vmem_to_hbm [thread:$0]  %s1686_s19, 1024, %s2509_s5, [#allocation6], %s2197_s1, %s2197_s1, %s2198_s15  }
 0x826   :  { %2193 = dma.done.wait [#allocation6], 1024  }
 0x827   :  { %2194 = vsyncadd [#allocation6], 4294966272 }
 0x828   :  { %1695 = vsyncpa [#allocation5], 1 }
 0x829   :  { %1696 = vsyncpa [#allocation8], 1 }
 0x82a   :  { %1697 = vsyncpa [#allocation11], 1 }
 0x82b   :  { %1698 = vsyncpa [#allocation6], 1 }

</bundles_post_ra>
